<compile_context>
chip_gen: v7x
topology: tpu7x:2x2x1
jax: 0.10.0
libtpu: 0.0.40
codegen_flags: <defaults>
</compile_context>

<pallas_src>
import functools

import jax
import jax.numpy as jnp
import numpy as np
from jax import lax
from jax.experimental import pallas as pl
from jax.experimental.pallas import tpu as pltpu


def _round_up(x, m):
    return (x + m - 1) // m * m


def _pad_gate_cols(m, h, hp):
    """(rows, 4h) -> (rows, 4hp): pad each i/f/g/o gate block with zero columns
    so gate slices in the kernel fall on 128-lane boundaries."""
    if hp == h:
        return m
    parts = [jnp.pad(m[:, g * h:(g + 1) * h], ((0, 0), (0, hp - h)))
             for g in range(4)]
    return jnp.concatenate(parts, axis=1)


def _sigmoid_eup(x):
    # sigmoid(x) == 0.5 * tanh(0.5 * x) + 0.5 : a single EUP op per gate.
    return 0.5 * jnp.tanh(0.5 * x) + 0.5


def _vmem_capacity_bytes():
    try:
        cap = int(pltpu.get_tpu_info().vmem_capacity_bytes)
        if cap > 0:
            return cap
    except Exception:
        pass
    return 64 * 2 ** 20          # conservative default (v7x per-TC VMEM)


def _num_tensorcores():
    try:
        info = pltpu.get_tpu_info()
        for attr in ("num_tensorcores", "tensorcores_per_chip", "num_cores",
                     "cores_per_chip", "core_count"):
            v = getattr(info, attr, None)
            if isinstance(v, int) and v > 0:
                return v
    except Exception:
        pass
    return 1                     # conservative: no batch split


@functools.lru_cache(maxsize=None)
def _supports_single_buffered_consts():
    """One-time, tiny feature probe for pl.Buffered(1) (no real-layer compile)."""
    if not hasattr(pl, "Buffered"):
        return False

    def _probe(x_ref, o_ref):
        o_ref[...] = x_ref[...] + 1.0

    try:
        fn = pl.pallas_call(
            _probe,
            grid=(2,),
            in_specs=[pl.BlockSpec((8, 128), lambda i: (0, 0),
                                   pipeline_mode=pl.Buffered(1))],
            out_specs=pl.BlockSpec((8, 128), lambda i: (0, 0)),
            out_shape=jax.ShapeDtypeStruct((8, 128), jnp.float32),
        )
        jax.block_until_ready(fn(jnp.zeros((8, 128), jnp.float32)))
        return True
    except Exception:
        return False


# ---------------------------------------------------------------------------
# Pallas kernel: one LSTM layer.
# grid = (batch blocks [parallel], time chunks [arbitrary]).
# ---------------------------------------------------------------------------
def _lstm_layer_kernel(x_ref, wih_ref, whh_ref, b_ref, h0_ref, c0_ref,
                       y_ref, hn_ref, cn_ref, gx_sc,
                       *, time_chunk, t_real, needs_mask, hp, n_unroll):
    chunk = pl.program_id(1)

    # Initialize the VMEM-resident carry (h_n / c_n outputs double as carry).
    @pl.when(chunk == 0)
    def _():
        hn_ref[...] = h0_ref[...]
        cn_ref[...] = c0_ref[...]

    bb = x_ref.shape[1]
    ip = x_ref.shape[2]

    # Whole-chunk input projection + bias in ONE MXU matmul, hoisted out of the
    # serial recurrence (bf16 operands, f32 accumulation).
    x2 = x_ref[...].reshape(time_chunk * bb, ip)
    gx = jnp.dot(x2, wih_ref[...],
                 preferred_element_type=jnp.float32) + b_ref[...]
    gx_sc[...] = gx.reshape(time_chunk, bb, 4 * hp)

    whh = whh_ref[...]                                  # (Hp, 4Hp) bf16, hoisted

    def step(t, carry):
        h_prev, c_prev = carry                          # f32 (BB, Hp)
        gates = gx_sc[t] + jnp.dot(h_prev.astype(jnp.bfloat16), whh,
                                   preferred_element_type=jnp.float32)

        # PyTorch gate order: i, f, g, o (each Hp wide, lane-aligned slices).
        i = _sigmoid_eup(gates[:, 0 * hp:1 * hp])
        f = _sigmoid_eup(gates[:, 1 * hp:2 * hp])
        g = jnp.tanh(gates[:, 2 * hp:3 * hp])
        o = _sigmoid_eup(gates[:, 3 * hp:4 * hp])

        c_new = f * c_prev + i * g
        h_new = o * jnp.tanh(c_new)

        if needs_mask:  # static: only when T was padded up to a chunk multiple
            valid = (chunk * time_chunk + t) < t_real
            h_new = jnp.where(valid, h_new, h_prev)
            c_new = jnp.where(valid, c_new, c_prev)

        y_ref[t] = h_new.astype(y_ref.dtype)
        return (h_new, c_new)

    h_fin, c_fin = lax.fori_loop(0, time_chunk, step,
                                 (hn_ref[...], cn_ref[...]), unroll=n_unroll)
    hn_ref[...] = h_fin
    cn_ref[...] = c_fin


def _lstm_layer_pallas(x_tm, w_ih, w_hh, bias, h0, c0, *, t_real, time_chunk,
                       n_batch_blocks, out_dtype, single_buffer_consts):
    """One LSTM layer.

    x_tm:  (Tp, Bp, Ip)  time-major, padded, bf16
    w_ih:  (Ip, 4Hp)     W_ih^T, gate-block padded, bf16
    w_hh:  (Hp, 4Hp)     W_hh^T, gate-block padded, bf16
    bias:  (1, 4Hp)      b_ih + b_hh, gate-block padded, f32
    h0,c0: (Bp, Hp)      padded initial state, f32
    returns y (Tp, Bp, Hp) in out_dtype, h_n (Bp, Hp) f32, c_n (Bp, Hp) f32
    """
    tp, bp, ip = x_tm.shape
    hp = h0.shape[-1]
    n_chunks = tp // time_chunk
    bb = bp // n_batch_blocks
    needs_mask = tp != t_real
    n_unroll = time_chunk if time_chunk <= 16 else 8

    def const_spec(shape):
        # Constant-index (resident) blocks: request single buffering so the
        # dominant VMEM consumers (the weights) are not double-buffered.
        if single_buffer_consts:
            return pl.BlockSpec(shape, lambda b, t: (0, 0),
                                pipeline_mode=pl.Buffered(1))
        return pl.BlockSpec(shape, lambda b, t: (0, 0))

    grid_spec = pltpu.PrefetchScalarGridSpec(
        num_scalar_prefetch=0,
        grid=(n_batch_blocks, n_chunks),
        in_specs=[
            pl.BlockSpec((time_chunk, bb, ip), lambda b, t: (t, b, 0)),  # x
            const_spec(w_ih.shape),                                      # W_ih
            const_spec(w_hh.shape),                                      # W_hh
            const_spec(bias.shape),                                      # bias
            pl.BlockSpec((bb, hp), lambda b, t: (b, 0)),                 # h0
            pl.BlockSpec((bb, hp), lambda b, t: (b, 0)),                 # c0
        ],
        out_specs=[
            pl.BlockSpec((time_chunk, bb, hp), lambda b, t: (t, b, 0)),  # y
            pl.BlockSpec((bb, hp), lambda b, t: (b, 0)),                 # h_n
            pl.BlockSpec((bb, hp), lambda b, t: (b, 0)),                 # c_n
        ],
        scratch_shapes=[
            pltpu.VMEM((time_chunk, bb, 4 * hp), jnp.float32),  # pre_gates_x
        ],
    )

    # VMEM budget: explicit limit derived from the tile sizes, capped below the
    # physical per-core VMEM of the running chip (v7x: 64 MiB) with headroom.
    out_itemsize = jnp.dtype(out_dtype).itemsize
    nbuf = 1 if single_buffer_consts else 2
    est = (2 * time_chunk * bb * ip * 2                 # x chunk blocks (bf16)
           + nbuf * ip * 4 * hp * 2                     # W_ih (bf16)
           + nbuf * hp * 4 * hp * 2                     # W_hh (bf16)
           + nbuf * 8 * 4 * hp * 4                      # bias (f32, padded)
           + 2 * 2 * bb * hp * 4                        # h0 / c0 blocks
           + 2 * time_chunk * bb * hp * out_itemsize    # y chunk blocks
           + 2 * 2 * bb * hp * 4                        # resident h_n / c_n
           + time_chunk * bb * 4 * hp * 4)              # pre_gates_x scratch
    cap = _vmem_capacity_bytes()
    vmem_limit = int(min(max(int(1.5 * est), 32 * 2 ** 20), cap - 8 * 2 ** 20))
    vmem_limit = max(vmem_limit, 16 * 2 ** 20)

    kernel = functools.partial(
        _lstm_layer_kernel, time_chunk=time_chunk, t_real=t_real,
        needs_mask=needs_mask, hp=hp, n_unroll=n_unroll)

    return pl.pallas_call(
        kernel,
        grid_spec=grid_spec,
        out_shape=(
            jax.ShapeDtypeStruct((tp, bp, hp), out_dtype),
            jax.ShapeDtypeStruct((bp, hp), jnp.float32),
            jax.ShapeDtypeStruct((bp, hp), jnp.float32),
        ),
        compiler_params=pltpu.CompilerParams(
            # batch rows are independent (parallel); time is a recurrence.
            dimension_semantics=("parallel", "arbitrary"),
            vmem_limit_bytes=vmem_limit,
        ),
    )(x_tm, w_ih, w_hh, bias, h0, c0)


def _run_lstm_layer(*args, **kwargs):
    return _lstm_layer_pallas(
        *args, single_buffer_consts=_supports_single_buffered_consts(),
        **kwargs)


# ---------------------------------------------------------------------------
# RecurrentNet-equivalent wrapper (rnn_type="lstm", batch_first=True).
# ---------------------------------------------------------------------------
class RecurrentNetPallas:
    def __init__(self, input_size, hidden_size, num_layers, key, time_chunk=32):
        self.input_size = input_size
        self.hidden_size = hidden_size
        self.num_layers = num_layers
        self.time_chunk = time_chunk
        self.hp = _round_up(hidden_size, 128)          # lane-padded hidden
        self.num_cores = _num_tensorcores()

        k = 1.0 / np.sqrt(hidden_size)
        self.layers = []
        for layer in range(num_layers):
            in_sz = input_size if layer == 0 else hidden_size
            in_p = _round_up(in_sz, 128)
            key, k1, k2, k3, k4 = jax.random.split(key, 5)
            # Same shapes / init distribution as torch.nn.LSTM.
            w_ih = jax.random.uniform(k1, (4 * hidden_size, in_sz),
                                      jnp.float32, -k, k)
            w_hh = jax.random.uniform(k2, (4 * hidden_size, hidden_size),
                                      jnp.float32, -k, k)
            b_ih = jax.random.uniform(k3, (4 * hidden_size,), jnp.float32, -k, k)
            b_hh = jax.random.uniform(k4, (4 * hidden_size,), jnp.float32, -k, k)

            # Kernel tensors: gate-block column padding (i|f|g|o each -> Hp),
            # zero row padding to Ip / Hp, transposed, bf16.
            w_ih_t = _pad_gate_cols(w_ih.T, hidden_size, self.hp)  # (in_sz,4Hp)
            w_ih_pad = jnp.zeros((in_p, 4 * self.hp), jnp.float32)
            w_ih_pad = w_ih_pad.at[:in_sz].set(w_ih_t)
            w_hh_t = _pad_gate_cols(w_hh.T, hidden_size, self.hp)  # (H, 4Hp)
            w_hh_pad = jnp.zeros((self.hp, 4 * self.hp), jnp.float32)
            w_hh_pad = w_hh_pad.at[:hidden_size].set(w_hh_t)
            b_pad = _pad_gate_cols((b_ih + b_hh).reshape(1, -1),
                                   hidden_size, self.hp)           # (1, 4Hp)

            self.layers.append(dict(
                # padded tensors consumed by the Pallas kernel
                w_ih_pad=w_ih_pad.astype(jnp.bfloat16),
                w_hh_pad=w_hh_pad.astype(jnp.bfloat16),
                b_pad=b_pad.astype(jnp.float32),
                in_p=in_p,
                # unpadded tensors for the pure-JAX references
                w_ih_t_f32=w_ih.T,                                 # (in_sz, 4H)
                w_hh_t_f32=w_hh.T,                                 # (H, 4H)
                bias=(b_ih + b_hh).reshape(1, -1),
            ))

    def __call__(self, x, h=None):
        """x: (B, T, input_size), batch_first. h: optional (h0, c0), each
        (num_layers, B, H). Returns (rnn_out (B, T, H), (h_n, c_n))."""
        B, T, _ = x.shape
        H, Hp, L = self.hidden_size, self.hp, self.num_layers
        Bp = _round_up(B, 16)                 # bf16 packs 16 rows per vreg
        TT = min(self.time_chunk, T)
        Tp = _round_up(T, TT)
        # Split the batch across TensorCores (v7x) when there is enough work.
        n_bb = 2 if (self.num_cores >= 2 and Bp >= 32) else 1

        if h is None:
            h0 = jnp.zeros((L, B, H), jnp.float32)
            c0 = jnp.zeros((L, B, H), jnp.float32)
        else:
            h0, c0 = h
        h0p = jnp.pad(h0.astype(jnp.float32),
                      ((0, 0), (0, Bp - B), (0, Hp - H)))
        c0p = jnp.pad(c0.astype(jnp.float32),
                      ((0, 0), (0, Bp - B), (0, Hp - H)))

        # Single transpose in: batch_first -> time-major, padded, bf16 operand.
        Ip0 = self.layers[0]["in_p"]
        x_tm = jnp.transpose(x, (1, 0, 2)).astype(jnp.float32)
        cur = jnp.pad(x_tm, ((0, Tp - T), (0, Bp - B), (0, Ip0 - x.shape[-1]))
                      ).astype(jnp.bfloat16)

        h_ns, c_ns = [], []
        for li, p in enumerate(self.layers):
            last = li == L - 1
            y, h_n, c_n = _run_lstm_layer(
                cur, p["w_ih_pad"], p["w_hh_pad"], p["b_pad"],
                h0p[li], c0p[li],
                t_real=T, time_chunk=TT, n_batch_blocks=n_bb,
                # Intermediate activations stay bf16/time-major and feed the
                # next layer directly; only the final layer emits f32.
                out_dtype=jnp.float32 if last else jnp.bfloat16)
            cur = y
            h_ns.append(h_n[:B, :H])
            c_ns.append(c_n[:B, :H])

        # Single transpose out: back to batch_first, unpadded.
        rnn_out = jnp.transpose(cur[:T, :B, :H], (1, 0, 2))
        return rnn_out, (jnp.stack(h_ns, 0), jnp.stack(c_ns, 0))


# ---------------------------------------------------------------------------
# Pure-JAX references (lax.scan) to validate the kernel numerically.
# ---------------------------------------------------------------------------
def _lstm_ref(x, layers, h0, c0, *, bf16_matmul):
    """bf16_matmul=True mirrors the kernel's MXU numerics (split x/h matmuls,
    bf16 operands, f32 accumulation); False is exact f32 torch.nn.LSTM math."""
    H = h0.shape[-1]
    y = jnp.transpose(x, (1, 0, 2)).astype(jnp.float32)
    h_ns, c_ns = [], []
    for li, p in enumerate(layers):
        if bf16_matmul:
            w_ih = p["w_ih_t_f32"].astype(jnp.bfloat16)
            w_hh = p["w_hh_t_f32"].astype(jnp.bfloat16)
        else:
            w_ih = p["w_ih_t_f32"]
            w_hh = p["w_hh_t_f32"]
        b = p["bias"]

        def step(carry, x_t, w_ih=w_ih, w_hh=w_hh, b=b):
            h_prev, c_prev = carry
            if bf16_matmul:
                gx = jnp.dot(x_t.astype(jnp.bfloat16), w_ih,
                             preferred_element_type=jnp.float32) + b
                gh = jnp.dot(h_prev.astype(jnp.bfloat16), w_hh,
                             preferred_element_type=jnp.float32)
            else:
                gx = jnp.dot(x_t, w_ih, preferred_element_type=jnp.float32) + b
                gh = jnp.dot(h_prev, w_hh, preferred_element_type=jnp.float32)
            gates = gx + gh
            i = jax.nn.sigmoid(gates[:, 0:H])
            f = jax.nn.sigmoid(gates[:, H:2 * H])
            g = jnp.tanh(gates[:, 2 * H:3 * H])
            o = jax.nn.sigmoid(gates[:, 3 * H:4 * H])
            c_new = f * c_prev + i * g
            h_new = o * jnp.tanh(c_new)
            return (h_new, c_new), h_new

        (h_n, c_n), y = lax.scan(step, (h0[li], c0[li]), y)
        h_ns.append(h_n)
        c_ns.append(c_n)
    return jnp.transpose(y, (1, 0, 2)), (jnp.stack(h_ns), jnp.stack(c_ns))


if __name__ == "__main__":
    B, T, I, H, L = 2, 8, 16, 32, 2

    key = jax.random.PRNGKey(0)
    key, kx, kh, kc, kp = jax.random.split(key, 5)
    x = jax.random.normal(kx, (B, T, I), jnp.float32)
    h0 = jax.random.normal(kh, (L, B, H), jnp.float32) * 0.1
    c0 = jax.random.normal(kc, (L, B, H), jnp.float32) * 0.1

    net = RecurrentNetPallas(input_size=I, hidden_size=H, num_layers=L, key=kp)

    rnn_out, (h_n, c_n) = net(x, (h0, c0))
    jax.block_until_ready((rnn_out, h_n, c_n))

    assert rnn_out.shape == (B, T, H)
    assert h_n.shape == (L, B, H) and c_n.shape == (L, B, H)

    # 1) Tight check vs. a reference that mirrors the kernel numerics
    #    (split x/h matmuls, bf16 MXU operands, f32 accumulation).
    ref_out, (ref_h, ref_c) = _lstm_ref(x, net.layers, h0, c0, bf16_matmul=True)
    np.testing.assert_allclose(np.asarray(rnn_out), np.asarray(ref_out),
                               rtol=2e-3, atol=2e-3)
    np.testing.assert_allclose(np.asarray(h_n), np.asarray(ref_h),
                               rtol=2e-3, atol=2e-3)
    np.testing.assert_allclose(np.asarray(c_n), np.asarray(ref_c),
                               rtol=2e-3, atol=2e-3)

    # 2) Loose check vs. exact f32 LSTM semantics (tolerance covers bf16 MXU).
    f32_out, (f32_h, f32_c) = _lstm_ref(x, net.layers, h0, c0, bf16_matmul=False)
    np.testing.assert_allclose(np.asarray(rnn_out), np.asarray(f32_out),
                               rtol=5e-2, atol=5e-2)
    np.testing.assert_allclose(np.asarray(h_n), np.asarray(f32_h),
                               rtol=5e-2, atol=5e-2)
    np.testing.assert_allclose(np.asarray(c_n), np.asarray(f32_c),
                               rtol=5e-2, atol=5e-2)

    print("KERNEL_OK")
</pallas_src>

<mosaic_0001>
module attributes {stable_mosaic.version = 11 : i64} {
  func.func @_probe(%arg0: i32, %arg1: memref<8x128xf32, #tpu.memory_space<vmem>>, %arg2: memref<8x128xf32, #tpu.memory_space<vmem>>) attributes {dimension_semantics = [#tpu.dimension_semantics<arbitrary>], iteration_bounds = array<i64: 2>, scalar_prefetch = 0 : i64, scratch_operands = 0 : i64, tpu.core_type = #tpu.core_type<tc>, window_params = [{pipeline_mode = #tpu.pipeline_mode<synchronous>, transform_indices = @transform_0, window_bounds = array<i64: 8, 128>}, {pipeline_mode = #tpu.pipeline_mode<synchronous>, transform_indices = @transform_1, window_bounds = array<i64: 8, 128>}]} {
    %c0 = arith.constant 0 : index
    %c0_0 = arith.constant 0 : index
    %0 = vector.load %arg1[%c0, %c0_0] : memref<8x128xf32, #tpu.memory_space<vmem>>, vector<8x128xf32>
    %cst = arith.constant 1.000000e+00 : f32
    %1 = vector.broadcast %cst : f32 to vector<8x128xf32>
    %2 = arith.addf %0, %1 : vector<8x128xf32>
    %c0_1 = arith.constant 0 : index
    %c0_2 = arith.constant 0 : index
    %3 = vector.load %arg2[%c0_1, %c0_2] : memref<8x128xf32, #tpu.memory_space<vmem>>, vector<8x128xf32>
    tpu.vector_store %arg2[%c0_1, %c0_2], %2 {strides = array<i32>} : memref<8x128xf32, #tpu.memory_space<vmem>>, vector<8x128xf32>,
    return
  }
  func.func @transform_0(%arg0: i32) -> (i32, i32) {
    %c0_i32 = arith.constant 0 : i32
    %c0_i32_0 = arith.constant 0 : i32
    %c0_i32_1 = arith.constant 0 : i32
    return %c0_i32, %c0_i32_0 : i32, i32
  }
  func.func @transform_1(%arg0: i32) -> (i32, i32) {
    %c0_i32 = arith.constant 0 : i32
    %c0_i32_0 = arith.constant 0 : i32
    %c0_i32_1 = arith.constant 0 : i32
    return %c0_i32, %c0_i32_0 : i32, i32
  }
}

module attributes {stable_mosaic.version = 11 : i64} {
  func.func @_lstm_layer_kernel(%arg0: i32, %arg1: i32, %arg2: memref<8x16x128xbf16, #tpu.memory_space<vmem>>, %arg3: memref<128x512xbf16, #tpu.memory_space<vmem>>, %arg4: memref<128x512xbf16, #tpu.memory_space<vmem>>, %arg5: memref<1x512xf32, #tpu.memory_space<vmem>>, %arg6: memref<16x128xf32, #tpu.memory_space<vmem>>, %arg7: memref<16x128xf32, #tpu.memory_space<vmem>>, %arg8: memref<8x16x128xbf16, #tpu.memory_space<vmem>>, %arg9: memref<16x128xf32, #tpu.memory_space<vmem>>, %arg10: memref<16x128xf32, #tpu.memory_space<vmem>>, %arg11: memref<8x16x512xf32, #tpu.memory_space<vmem>>) attributes {dimension_semantics = [#tpu.dimension_semantics<parallel>, #tpu.dimension_semantics<arbitrary>], iteration_bounds = array<i64: 1, 1>, scalar_prefetch = 0 : i64, scratch_operands = 1 : i64, tpu.core_type = #tpu.core_type<tc>, window_params = [{transform_indices = @transform_0, window_bounds = array<i64: 8, 16, 128>}, {pipeline_mode = #tpu.pipeline_mode<synchronous>, transform_indices = @transform_1, window_bounds = array<i64: 128, 512>}, {pipeline_mode = #tpu.pipeline_mode<synchronous>, transform_indices = @transform_2, window_bounds = array<i64: 128, 512>}, {pipeline_mode = #tpu.pipeline_mode<synchronous>, transform_indices = @transform_3, window_bounds = array<i64: 1, 512>}, {transform_indices = @transform_4, window_bounds = array<i64: 16, 128>}, {transform_indices = @transform_5, window_bounds = array<i64: 16, 128>}, {transform_indices = @transform_6, window_bounds = array<i64: 8, 16, 128>}, {transform_indices = @transform_7, window_bounds = array<i64: 16, 128>}, {transform_indices = @transform_8, window_bounds = array<i64: 16, 128>}]} {
    %c0_i32 = arith.constant 0 : i32
    %0 = arith.cmpi eq, %arg1, %c0_i32 : i32
    %1 = arith.extui %0 : i1 to i32
    %c0_i32_0 = arith.constant 0 : i32
    %2 = arith.cmpi ne, %1, %c0_i32_0 : i32
    scf.if %2 {
      %c0_133 = arith.constant 0 : index
      %c0_134 = arith.constant 0 : index
      %353 = vector.load %arg6[%c0_133, %c0_134] : memref<16x128xf32, #tpu.memory_space<vmem>>, vector<16x128xf32>
      %c0_135 = arith.constant 0 : index
      %c0_136 = arith.constant 0 : index
      %354 = vector.load %arg9[%c0_135, %c0_136] : memref<16x128xf32, #tpu.memory_space<vmem>>, vector<16x128xf32>
      tpu.vector_store %arg9[%c0_135, %c0_136], %353 {strides = array<i32>} : memref<16x128xf32, #tpu.memory_space<vmem>>, vector<16x128xf32>,
      %c0_137 = arith.constant 0 : index
      %c0_138 = arith.constant 0 : index
      %355 = vector.load %arg7[%c0_137, %c0_138] : memref<16x128xf32, #tpu.memory_space<vmem>>, vector<16x128xf32>
      %c0_139 = arith.constant 0 : index
      %c0_140 = arith.constant 0 : index
      %356 = vector.load %arg10[%c0_139, %c0_140] : memref<16x128xf32, #tpu.memory_space<vmem>>, vector<16x128xf32>
      tpu.vector_store %arg10[%c0_139, %c0_140], %355 {strides = array<i32>} : memref<16x128xf32, #tpu.memory_space<vmem>>, vector<16x128xf32>,
    } else {
    }
    %c0 = arith.constant 0 : index
    %c0_1 = arith.constant 0 : index
    %c0_2 = arith.constant 0 : index
    %3 = vector.load %arg2[%c0, %c0_1, %c0_2] : memref<8x16x128xbf16, #tpu.memory_space<vmem>>, vector<8x16x128xbf16>
    %4 = vector.shape_cast %3 : vector<8x16x128xbf16> to vector<128x128xbf16>
    %c0_3 = arith.constant 0 : index
    %c0_4 = arith.constant 0 : index
    %5 = vector.load %arg3[%c0_3, %c0_4] : memref<128x512xbf16, #tpu.memory_space<vmem>>, vector<128x512xbf16>
    %cst = arith.constant dense<0.000000e+00> : vector<128x512xf32>
    %6 = tpu.matmul %4, %5, %cst {dimension_numbers = #tpu.dot_dimension_numbers<[1], [0], [0], [1], [0, 0, 1, 1], [], []>} : vector<128x128xbf16>, vector<128x512xbf16>, vector<128x512xf32> -> vector<128x512xf32>
    %c0_5 = arith.constant 0 : index
    %c0_6 = arith.constant 0 : index
    %7 = vector.load %arg5[%c0_5, %c0_6] : memref<1x512xf32, #tpu.memory_space<vmem>>, vector<1x512xf32>
    %8 = vector.broadcast %7 : vector<1x512xf32> to vector<128x512xf32>
    %9 = arith.addf %6, %8 : vector<128x512xf32>
    %10 = vector.shape_cast %9 : vector<128x512xf32> to vector<8x16x512xf32>
    %c0_7 = arith.constant 0 : index
    %c0_8 = arith.constant 0 : index
    %c0_9 = arith.constant 0 : index
    %11 = vector.load %arg11[%c0_7, %c0_8, %c0_9] : memref<8x16x512xf32, #tpu.memory_space<vmem>>, vector<8x16x512xf32>
    tpu.vector_store %arg11[%c0_7, %c0_8, %c0_9], %10 {strides = array<i32>} : memref<8x16x512xf32, #tpu.memory_space<vmem>>, vector<8x16x512xf32>,
    %c0_10 = arith.constant 0 : index
    %c0_11 = arith.constant 0 : index
    %12 = vector.load %arg4[%c0_10, %c0_11] : memref<128x512xbf16, #tpu.memory_space<vmem>>, vector<128x512xbf16>
    %c0_12 = arith.constant 0 : index
    %c0_13 = arith.constant 0 : index
    %13 = vector.load %arg9[%c0_12, %c0_13] : memref<16x128xf32, #tpu.memory_space<vmem>>, vector<16x128xf32>
    %c0_14 = arith.constant 0 : index
    %c0_15 = arith.constant 0 : index
    %14 = vector.load %arg10[%c0_14, %c0_15] : memref<16x128xf32, #tpu.memory_space<vmem>>, vector<16x128xf32>
    %c0_i32_16 = arith.constant 0 : i32
    %15 = arith.index_cast %c0_i32_16 : i32 to index
    %c0_17 = arith.constant 0 : index
    %c0_18 = arith.constant 0 : index
    %16 = vector.load %arg11[%15, %c0_17, %c0_18] : memref<8x16x512xf32, #tpu.memory_space<vmem>>, vector<1x16x512xf32>
    %17 = vector.shape_cast %16 : vector<1x16x512xf32> to vector<16x512xf32>
    %18 = arith.truncf %13 : vector<16x128xf32> to vector<16x128xbf16>
    %cst_19 = arith.constant dense<0.000000e+00> : vector<16x512xf32>
    %19 = tpu.matmul %18, %12, %cst_19 {dimension_numbers = #tpu.dot_dimension_numbers<[1], [0], [0], [1], [0, 0, 1, 1], [], []>} : vector<16x128xbf16>, vector<128x512xbf16>, vector<16x512xf32> -> vector<16x512xf32>
    %20 = arith.addf %17, %19 : vector<16x512xf32>
    %21 = vector.extract_strided_slice %20 {offsets = [0, 0], sizes = [16, 128], strides = [1, 1]} : vector<16x512xf32> to vector<16x128xf32>
    %cst_20 = arith.constant 5.000000e-01 : f32
    %22 = vector.broadcast %cst_20 : f32 to vector<16x128xf32>
    %23 = arith.mulf %22, %21 : vector<16x128xf32>
    %24 = math.tanh %23 : vector<16x128xf32>
    %cst_21 = arith.constant 5.000000e-01 : f32
    %25 = vector.broadcast %cst_21 : f32 to vector<16x128xf32>
    %26 = arith.mulf %25, %24 : vector<16x128xf32>
    %cst_22 = arith.constant 5.000000e-01 : f32
    %27 = vector.broadcast %cst_22 : f32 to vector<16x128xf32>
    %28 = arith.addf %26, %27 : vector<16x128xf32>
    %29 = vector.extract_strided_slice %20 {offsets = [0, 128], sizes = [16, 128], strides = [1, 1]} : vector<16x512xf32> to vector<16x128xf32>
    %cst_23 = arith.constant 5.000000e-01 : f32
    %30 = vector.broadcast %cst_23 : f32 to vector<16x128xf32>
    %31 = arith.mulf %30, %29 : vector<16x128xf32>
    %32 = math.tanh %31 : vector<16x128xf32>
    %cst_24 = arith.constant 5.000000e-01 : f32
    %33 = vector.broadcast %cst_24 : f32 to vector<16x128xf32>
    %34 = arith.mulf %33, %32 : vector<16x128xf32>
    %cst_25 = arith.constant 5.000000e-01 : f32
    %35 = vector.broadcast %cst_25 : f32 to vector<16x128xf32>
    %36 = arith.addf %34, %35 : vector<16x128xf32>
    %37 = vector.extract_strided_slice %20 {offsets = [0, 256], sizes = [16, 128], strides = [1, 1]} : vector<16x512xf32> to vector<16x128xf32>
    %38 = math.tanh %37 : vector<16x128xf32>
    %39 = vector.extract_strided_slice %20 {offsets = [0, 384], sizes = [16, 128], strides = [1, 1]} : vector<16x512xf32> to vector<16x128xf32>
    %cst_26 = arith.constant 5.000000e-01 : f32
    %40 = vector.broadcast %cst_26 : f32 to vector<16x128xf32>
    %41 = arith.mulf %40, %39 : vector<16x128xf32>
    %42 = math.tanh %41 : vector<16x128xf32>
    %cst_27 = arith.constant 5.000000e-01 : f32
    %43 = vector.broadcast %cst_27 : f32 to vector<16x128xf32>
    %44 = arith.mulf %43, %42 : vector<16x128xf32>
    %cst_28 = arith.constant 5.000000e-01 : f32
    %45 = vector.broadcast %cst_28 : f32 to vector<16x128xf32>
    %46 = arith.addf %44, %45 : vector<16x128xf32>
    %47 = arith.mulf %36, %14 : vector<16x128xf32>
    %48 = arith.mulf %28, %38 : vector<16x128xf32>
    %49 = arith.addf %47, %48 : vector<16x128xf32>
    %50 = math.tanh %49 : vector<16x128xf32>
    %51 = arith.mulf %46, %50 : vector<16x128xf32>
    %52 = arith.truncf %51 : vector<16x128xf32> to vector<16x128xbf16>
    %53 = arith.index_cast %c0_i32_16 : i32 to index
    %c0_29 = arith.constant 0 : index
    %c0_30 = arith.constant 0 : index
    %54 = vector.load %arg8[%53, %c0_29, %c0_30] : memref<8x16x128xbf16, #tpu.memory_space<vmem>>, vector<1x16x128xbf16>
    %55 = vector.shape_cast %54 : vector<1x16x128xbf16> to vector<16x128xbf16>
    %56 = vector.shape_cast %52 : vector<16x128xbf16> to vector<1x16x128xbf16>
    tpu.vector_store %arg8[%53, %c0_29, %c0_30], %56 {strides = array<i32>} : memref<8x16x128xbf16, #tpu.memory_space<vmem>>, vector<1x16x128xbf16>,
    %c1_i32 = arith.constant 1 : i32
    %57 = arith.index_cast %c1_i32 : i32 to index
    %c0_31 = arith.constant 0 : index
    %c0_32 = arith.constant 0 : index
    %58 = vector.load %arg11[%57, %c0_31, %c0_32] : memref<8x16x512xf32, #tpu.memory_space<vmem>>, vector<1x16x512xf32>
    %59 = vector.shape_cast %58 : vector<1x16x512xf32> to vector<16x512xf32>
    %60 = arith.truncf %51 : vector<16x128xf32> to vector<16x128xbf16>
    %cst_33 = arith.constant dense<0.000000e+00> : vector<16x512xf32>
    %61 = tpu.matmul %60, %12, %cst_33 {dimension_numbers = #tpu.dot_dimension_numbers<[1], [0], [0], [1], [0, 0, 1, 1], [], []>} : vector<16x128xbf16>, vector<128x512xbf16>, vector<16x512xf32> -> vector<16x512xf32>
    %62 = arith.addf %59, %61 : vector<16x512xf32>
    %63 = vector.extract_strided_slice %62 {offsets = [0, 0], sizes = [16, 128], strides = [1, 1]} : vector<16x512xf32> to vector<16x128xf32>
    %cst_34 = arith.constant 5.000000e-01 : f32
    %64 = vector.broadcast %cst_34 : f32 to vector<16x128xf32>
    %65 = arith.mulf %64, %63 : vector<16x128xf32>
    %66 = math.tanh %65 : vector<16x128xf32>
    %cst_35 = arith.constant 5.000000e-01 : f32
    %67 = vector.broadcast %cst_35 : f32 to vector<16x128xf32>
    %68 = arith.mulf %67, %66 : vector<16x128xf32>
    %cst_36 = arith.constant 5.000000e-01 : f32
    %69 = vector.broadcast %cst_36 : f32 to vector<16x128xf32>
    %70 = arith.addf %68, %69 : vector<16x128xf32>
    %71 = vector.extract_strided_slice %62 {offsets = [0, 128], sizes = [16, 128], strides = [1, 1]} : vector<16x512xf32> to vector<16x128xf32>
    %cst_37 = arith.constant 5.000000e-01 : f32
    %72 = vector.broadcast %cst_37 : f32 to vector<16x128xf32>
    %73 = arith.mulf %72, %71 : vector<16x128xf32>
    %74 = math.tanh %73 : vector<16x128xf32>
    %cst_38 = arith.constant 5.000000e-01 : f32
    %75 = vector.broadcast %cst_38 : f32 to vector<16x128xf32>
    %76 = arith.mulf %75, %74 : vector<16x128xf32>
    %cst_39 = arith.constant 5.000000e-01 : f32
    %77 = vector.broadcast %cst_39 : f32 to vector<16x128xf32>
    %78 = arith.addf %76, %77 : vector<16x128xf32>
    %79 = vector.extract_strided_slice %62 {offsets = [0, 256], sizes = [16, 128], strides = [1, 1]} : vector<16x512xf32> to vector<16x128xf32>
    %80 = math.tanh %79 : vector<16x128xf32>
    %81 = vector.extract_strided_slice %62 {offsets = [0, 384], sizes = [16, 128], strides = [1, 1]} : vector<16x512xf32> to vector<16x128xf32>
    %cst_40 = arith.constant 5.000000e-01 : f32
    %82 = vector.broadcast %cst_40 : f32 to vector<16x128xf32>
    %83 = arith.mulf %82, %81 : vector<16x128xf32>
    %84 = math.tanh %83 : vector<16x128xf32>
    %cst_41 = arith.constant 5.000000e-01 : f32
    %85 = vector.broadcast %cst_41 : f32 to vector<16x128xf32>
    %86 = arith.mulf %85, %84 : vector<16x128xf32>
    %cst_42 = arith.constant 5.000000e-01 : f32
    %87 = vector.broadcast %cst_42 : f32 to vector<16x128xf32>
    %88 = arith.addf %86, %87 : vector<16x128xf32>
    %89 = arith.mulf %78, %49 : vector<16x128xf32>
    %90 = arith.mulf %70, %80 : vector<16x128xf32>
    %91 = arith.addf %89, %90 : vector<16x128xf32>
    %92 = math.tanh %91 : vector<16x128xf32>
    %93 = arith.mulf %88, %92 : vector<16x128xf32>
    %94 = arith.truncf %93 : vector<16x128xf32> to vector<16x128xbf16>
    %95 = arith.index_cast %c1_i32 : i32 to index
    %c0_43 = arith.constant 0 : index
    %c0_44 = arith.constant 0 : index
    %96 = vector.load %arg8[%95, %c0_43, %c0_44] : memref<8x16x128xbf16, #tpu.memory_space<vmem>>, vector<1x16x128xbf16>
    %97 = vector.shape_cast %96 : vector<1x16x128xbf16> to vector<16x128xbf16>
    %98 = vector.shape_cast %94 : vector<16x128xbf16> to vector<1x16x128xbf16>
    tpu.vector_store %arg8[%95, %c0_43, %c0_44], %98 {strides = array<i32>} : memref<8x16x128xbf16, #tpu.memory_space<vmem>>, vector<1x16x128xbf16>,
    %c2_i32 = arith.constant 2 : i32
    %99 = arith.index_cast %c2_i32 : i32 to index
    %c0_45 = arith.constant 0 : index
    %c0_46 = arith.constant 0 : index
    %100 = vector.load %arg11[%99, %c0_45, %c0_46] : memref<8x16x512xf32, #tpu.memory_space<vmem>>, vector<1x16x512xf32>
    %101 = vector.shape_cast %100 : vector<1x16x512xf32> to vector<16x512xf32>
    %102 = arith.truncf %93 : vector<16x128xf32> to vector<16x128xbf16>
    %cst_47 = arith.constant dense<0.000000e+00> : vector<16x512xf32>
    %103 = tpu.matmul %102, %12, %cst_47 {dimension_numbers = #tpu.dot_dimension_numbers<[1], [0], [0], [1], [0, 0, 1, 1], [], []>} : vector<16x128xbf16>, vector<128x512xbf16>, vector<16x512xf32> -> vector<16x512xf32>
    %104 = arith.addf %101, %103 : vector<16x512xf32>
    %105 = vector.extract_strided_slice %104 {offsets = [0, 0], sizes = [16, 128], strides = [1, 1]} : vector<16x512xf32> to vector<16x128xf32>
    %cst_48 = arith.constant 5.000000e-01 : f32
    %106 = vector.broadcast %cst_48 : f32 to vector<16x128xf32>
    %107 = arith.mulf %106, %105 : vector<16x128xf32>
    %108 = math.tanh %107 : vector<16x128xf32>
    %cst_49 = arith.constant 5.000000e-01 : f32
    %109 = vector.broadcast %cst_49 : f32 to vector<16x128xf32>
    %110 = arith.mulf %109, %108 : vector<16x128xf32>
    %cst_50 = arith.constant 5.000000e-01 : f32
    %111 = vector.broadcast %cst_50 : f32 to vector<16x128xf32>
    %112 = arith.addf %110, %111 : vector<16x128xf32>
    %113 = vector.extract_strided_slice %104 {offsets = [0, 128], sizes = [16, 128], strides = [1, 1]} : vector<16x512xf32> to vector<16x128xf32>
    %cst_51 = arith.constant 5.000000e-01 : f32
    %114 = vector.broadcast %cst_51 : f32 to vector<16x128xf32>
    %115 = arith.mulf %114, %113 : vector<16x128xf32>
    %116 = math.tanh %115 : vector<16x128xf32>
    %cst_52 = arith.constant 5.000000e-01 : f32
    %117 = vector.broadcast %cst_52 : f32 to vector<16x128xf32>
    %118 = arith.mulf %117, %116 : vector<16x128xf32>
    %cst_53 = arith.constant 5.000000e-01 : f32
    %119 = vector.broadcast %cst_53 : f32 to vector<16x128xf32>
    %120 = arith.addf %118, %119 : vector<16x128xf32>
    %121 = vector.extract_strided_slice %104 {offsets = [0, 256], sizes = [16, 128], strides = [1, 1]} : vector<16x512xf32> to vector<16x128xf32>
    %122 = math.tanh %121 : vector<16x128xf32>
    %123 = vector.extract_strided_slice %104 {offsets = [0, 384], sizes = [16, 128], strides = [1, 1]} : vector<16x512xf32> to vector<16x128xf32>
    %cst_54 = arith.constant 5.000000e-01 : f32
    %124 = vector.broadcast %cst_54 : f32 to vector<16x128xf32>
    %125 = arith.mulf %124, %123 : vector<16x128xf32>
    %126 = math.tanh %125 : vector<16x128xf32>
    %cst_55 = arith.constant 5.000000e-01 : f32
    %127 = vector.broadcast %cst_55 : f32 to vector<16x128xf32>
    %128 = arith.mulf %127, %126 : vector<16x128xf32>
    %cst_56 = arith.constant 5.000000e-01 : f32
    %129 = vector.broadcast %cst_56 : f32 to vector<16x128xf32>
    %130 = arith.addf %128, %129 : vector<16x128xf32>
    %131 = arith.mulf %120, %91 : vector<16x128xf32>
    %132 = arith.mulf %112, %122 : vector<16x128xf32>
    %133 = arith.addf %131, %132 : vector<16x128xf32>
    %134 = math.tanh %133 : vector<16x128xf32>
    %135 = arith.mulf %130, %134 : vector<16x128xf32>
    %136 = arith.truncf %135 : vector<16x128xf32> to vector<16x128xbf16>
    %137 = arith.index_cast %c2_i32 : i32 to index
    %c0_57 = arith.constant 0 : index
    %c0_58 = arith.constant 0 : index
    %138 = vector.load %arg8[%137, %c0_57, %c0_58] : memref<8x16x128xbf16, #tpu.memory_space<vmem>>, vector<1x16x128xbf16>
    %139 = vector.shape_cast %138 : vector<1x16x128xbf16> to vector<16x128xbf16>
    %140 = vector.shape_cast %136 : vector<16x128xbf16> to vector<1x16x128xbf16>
    tpu.vector_store %arg8[%137, %c0_57, %c0_58], %140 {strides = array<i32>} : memref<8x16x128xbf16, #tpu.memory_space<vmem>>, vector<1x16x128xbf16>,
    %c3_i32 = arith.constant 3 : i32
    %141 = arith.index_cast %c3_i32 : i32 to index
    %c0_59 = arith.constant 0 : index
    %c0_60 = arith.constant 0 : index
    %142 = vector.load %arg11[%141, %c0_59, %c0_60] : memref<8x16x512xf32, #tpu.memory_space<vmem>>, vector<1x16x512xf32>
    %143 = vector.shape_cast %142 : vector<1x16x512xf32> to vector<16x512xf32>
    %144 = arith.truncf %135 : vector<16x128xf32> to vector<16x128xbf16>
    %cst_61 = arith.constant dense<0.000000e+00> : vector<16x512xf32>
    %145 = tpu.matmul %144, %12, %cst_61 {dimension_numbers = #tpu.dot_dimension_numbers<[1], [0], [0], [1], [0, 0, 1, 1], [], []>} : vector<16x128xbf16>, vector<128x512xbf16>, vector<16x512xf32> -> vector<16x512xf32>
    %146 = arith.addf %143, %145 : vector<16x512xf32>
    %147 = vector.extract_strided_slice %146 {offsets = [0, 0], sizes = [16, 128], strides = [1, 1]} : vector<16x512xf32> to vector<16x128xf32>
    %cst_62 = arith.constant 5.000000e-01 : f32
    %148 = vector.broadcast %cst_62 : f32 to vector<16x128xf32>
    %149 = arith.mulf %148, %147 : vector<16x128xf32>
    %150 = math.tanh %149 : vector<16x128xf32>
    %cst_63 = arith.constant 5.000000e-01 : f32
    %151 = vector.broadcast %cst_63 : f32 to vector<16x128xf32>
    %152 = arith.mulf %151, %150 : vector<16x128xf32>
    %cst_64 = arith.constant 5.000000e-01 : f32
    %153 = vector.broadcast %cst_64 : f32 to vector<16x128xf32>
    %154 = arith.addf %152, %153 : vector<16x128xf32>
    %155 = vector.extract_strided_slice %146 {offsets = [0, 128], sizes = [16, 128], strides = [1, 1]} : vector<16x512xf32> to vector<16x128xf32>
    %cst_65 = arith.constant 5.000000e-01 : f32
    %156 = vector.broadcast %cst_65 : f32 to vector<16x128xf32>
    %157 = arith.mulf %156, %155 : vector<16x128xf32>
    %158 = math.tanh %157 : vector<16x128xf32>
    %cst_66 = arith.constant 5.000000e-01 : f32
    %159 = vector.broadcast %cst_66 : f32 to vector<16x128xf32>
    %160 = arith.mulf %159, %158 : vector<16x128xf32>
    %cst_67 = arith.constant 5.000000e-01 : f32
    %161 = vector.broadcast %cst_67 : f32 to vector<16x128xf32>
    %162 = arith.addf %160, %161 : vector<16x128xf32>
    %163 = vector.extract_strided_slice %146 {offsets = [0, 256], sizes = [16, 128], strides = [1, 1]} : vector<16x512xf32> to vector<16x128xf32>
    %164 = math.tanh %163 : vector<16x128xf32>
    %165 = vector.extract_strided_slice %146 {offsets = [0, 384], sizes = [16, 128], strides = [1, 1]} : vector<16x512xf32> to vector<16x128xf32>
    %cst_68 = arith.constant 5.000000e-01 : f32
    %166 = vector.broadcast %cst_68 : f32 to vector<16x128xf32>
    %167 = arith.mulf %166, %165 : vector<16x128xf32>
    %168 = math.tanh %167 : vector<16x128xf32>
    %cst_69 = arith.constant 5.000000e-01 : f32
    %169 = vector.broadcast %cst_69 : f32 to vector<16x128xf32>
    %170 = arith.mulf %169, %168 : vector<16x128xf32>
    %cst_70 = arith.constant 5.000000e-01 : f32
    %171 = vector.broadcast %cst_70 : f32 to vector<16x128xf32>
    %172 = arith.addf %170, %171 : vector<16x128xf32>
    %173 = arith.mulf %162, %133 : vector<16x128xf32>
    %174 = arith.mulf %154, %164 : vector<16x128xf32>
    %175 = arith.addf %173, %174 : vector<16x128xf32>
    %176 = math.tanh %175 : vector<16x128xf32>
    %177 = arith.mulf %172, %176 : vector<16x128xf32>
    %178 = arith.truncf %177 : vector<16x128xf32> to vector<16x128xbf16>
    %179 = arith.index_cast %c3_i32 : i32 to index
    %c0_71 = arith.constant 0 : index
    %c0_72 = arith.constant 0 : index
    %180 = vector.load %arg8[%179, %c0_71, %c0_72] : memref<8x16x128xbf16, #tpu.memory_space<vmem>>, vector<1x16x128xbf16>
    %181 = vector.shape_cast %180 : vector<1x16x128xbf16> to vector<16x128xbf16>
    %182 = vector.shape_cast %178 : vector<16x128xbf16> to vector<1x16x128xbf16>
    tpu.vector_store %arg8[%179, %c0_71, %c0_72], %182 {strides = array<i32>} : memref<8x16x128xbf16, #tpu.memory_space<vmem>>, vector<1x16x128xbf16>,
    %c4_i32 = arith.constant 4 : i32
    %183 = arith.index_cast %c4_i32 : i32 to index
    %c0_73 = arith.constant 0 : index
    %c0_74 = arith.constant 0 : index
    %184 = vector.load %arg11[%183, %c0_73, %c0_74] : memref<8x16x512xf32, #tpu.memory_space<vmem>>, vector<1x16x512xf32>
    %185 = vector.shape_cast %184 : vector<1x16x512xf32> to vector<16x512xf32>
    %186 = arith.truncf %177 : vector<16x128xf32> to vector<16x128xbf16>
    %cst_75 = arith.constant dense<0.000000e+00> : vector<16x512xf32>
    %187 = tpu.matmul %186, %12, %cst_75 {dimension_numbers = #tpu.dot_dimension_numbers<[1], [0], [0], [1], [0, 0, 1, 1], [], []>} : vector<16x128xbf16>, vector<128x512xbf16>, vector<16x512xf32> -> vector<16x512xf32>
    %188 = arith.addf %185, %187 : vector<16x512xf32>
    %189 = vector.extract_strided_slice %188 {offsets = [0, 0], sizes = [16, 128], strides = [1, 1]} : vector<16x512xf32> to vector<16x128xf32>
    %cst_76 = arith.constant 5.000000e-01 : f32
    %190 = vector.broadcast %cst_76 : f32 to vector<16x128xf32>
    %191 = arith.mulf %190, %189 : vector<16x128xf32>
    %192 = math.tanh %191 : vector<16x128xf32>
    %cst_77 = arith.constant 5.000000e-01 : f32
    %193 = vector.broadcast %cst_77 : f32 to vector<16x128xf32>
    %194 = arith.mulf %193, %192 : vector<16x128xf32>
    %cst_78 = arith.constant 5.000000e-01 : f32
    %195 = vector.broadcast %cst_78 : f32 to vector<16x128xf32>
    %196 = arith.addf %194, %195 : vector<16x128xf32>
    %197 = vector.extract_strided_slice %188 {offsets = [0, 128], sizes = [16, 128], strides = [1, 1]} : vector<16x512xf32> to vector<16x128xf32>
    %cst_79 = arith.constant 5.000000e-01 : f32
    %198 = vector.broadcast %cst_79 : f32 to vector<16x128xf32>
    %199 = arith.mulf %198, %197 : vector<16x128xf32>
    %200 = math.tanh %199 : vector<16x128xf32>
    %cst_80 = arith.constant 5.000000e-01 : f32
    %201 = vector.broadcast %cst_80 : f32 to vector<16x128xf32>
    %202 = arith.mulf %201, %200 : vector<16x128xf32>
    %cst_81 = arith.constant 5.000000e-01 : f32
    %203 = vector.broadcast %cst_81 : f32 to vector<16x128xf32>
    %204 = arith.addf %202, %203 : vector<16x128xf32>
    %205 = vector.extract_strided_slice %188 {offsets = [0, 256], sizes = [16, 128], strides = [1, 1]} : vector<16x512xf32> to vector<16x128xf32>
    %206 = math.tanh %205 : vector<16x128xf32>
    %207 = vector.extract_strided_slice %188 {offsets = [0, 384], sizes = [16, 128], strides = [1, 1]} : vector<16x512xf32> to vector<16x128xf32>
    %cst_82 = arith.constant 5.000000e-01 : f32
    %208 = vector.broadcast %cst_82 : f32 to vector<16x128xf32>
    %209 = arith.mulf %208, %207 : vector<16x128xf32>
    %210 = math.tanh %209 : vector<16x128xf32>
    %cst_83 = arith.constant 5.000000e-01 : f32
    %211 = vector.broadcast %cst_83 : f32 to vector<16x128xf32>
    %212 = arith.mulf %211, %210 : vector<16x128xf32>
    %cst_84 = arith.constant 5.000000e-01 : f32
    %213 = vector.broadcast %cst_84 : f32 to vector<16x128xf32>
    %214 = arith.addf %212, %213 : vector<16x128xf32>
    %215 = arith.mulf %204, %175 : vector<16x128xf32>
    %216 = arith.mulf %196, %206 : vector<16x128xf32>
    %217 = arith.addf %215, %216 : vector<16x128xf32>
    %218 = math.tanh %217 : vector<16x128xf32>
    %219 = arith.mulf %214, %218 : vector<16x128xf32>
    %220 = arith.truncf %219 : vector<16x128xf32> to vector<16x128xbf16>
    %221 = arith.index_cast %c4_i32 : i32 to index
    %c0_85 = arith.constant 0 : index
    %c0_86 = arith.constant 0 : index
    %222 = vector.load %arg8[%221, %c0_85, %c0_86] : memref<8x16x128xbf16, #tpu.memory_space<vmem>>, vector<1x16x128xbf16>
    %223 = vector.shape_cast %222 : vector<1x16x128xbf16> to vector<16x128xbf16>
    %224 = vector.shape_cast %220 : vector<16x128xbf16> to vector<1x16x128xbf16>
    tpu.vector_store %arg8[%221, %c0_85, %c0_86], %224 {strides = array<i32>} : memref<8x16x128xbf16, #tpu.memory_space<vmem>>, vector<1x16x128xbf16>,
    %c5_i32 = arith.constant 5 : i32
    %225 = arith.index_cast %c5_i32 : i32 to index
    %c0_87 = arith.constant 0 : index
    %c0_88 = arith.constant 0 : index
    %226 = vector.load %arg11[%225, %c0_87, %c0_88] : memref<8x16x512xf32, #tpu.memory_space<vmem>>, vector<1x16x512xf32>
    %227 = vector.shape_cast %226 : vector<1x16x512xf32> to vector<16x512xf32>
    %228 = arith.truncf %219 : vector<16x128xf32> to vector<16x128xbf16>
    %cst_89 = arith.constant dense<0.000000e+00> : vector<16x512xf32>
    %229 = tpu.matmul %228, %12, %cst_89 {dimension_numbers = #tpu.dot_dimension_numbers<[1], [0], [0], [1], [0, 0, 1, 1], [], []>} : vector<16x128xbf16>, vector<128x512xbf16>, vector<16x512xf32> -> vector<16x512xf32>
    %230 = arith.addf %227, %229 : vector<16x512xf32>
    %231 = vector.extract_strided_slice %230 {offsets = [0, 0], sizes = [16, 128], strides = [1, 1]} : vector<16x512xf32> to vector<16x128xf32>
    %cst_90 = arith.constant 5.000000e-01 : f32
    %232 = vector.broadcast %cst_90 : f32 to vector<16x128xf32>
    %233 = arith.mulf %232, %231 : vector<16x128xf32>
    %234 = math.tanh %233 : vector<16x128xf32>
    %cst_91 = arith.constant 5.000000e-01 : f32
    %235 = vector.broadcast %cst_91 : f32 to vector<16x128xf32>
    %236 = arith.mulf %235, %234 : vector<16x128xf32>
    %cst_92 = arith.constant 5.000000e-01 : f32
    %237 = vector.broadcast %cst_92 : f32 to vector<16x128xf32>
    %238 = arith.addf %236, %237 : vector<16x128xf32>
    %239 = vector.extract_strided_slice %230 {offsets = [0, 128], sizes = [16, 128], strides = [1, 1]} : vector<16x512xf32> to vector<16x128xf32>
    %cst_93 = arith.constant 5.000000e-01 : f32
    %240 = vector.broadcast %cst_93 : f32 to vector<16x128xf32>
    %241 = arith.mulf %240, %239 : vector<16x128xf32>
    %242 = math.tanh %241 : vector<16x128xf32>
    %cst_94 = arith.constant 5.000000e-01 : f32
    %243 = vector.broadcast %cst_94 : f32 to vector<16x128xf32>
    %244 = arith.mulf %243, %242 : vector<16x128xf32>
    %cst_95 = arith.constant 5.000000e-01 : f32
    %245 = vector.broadcast %cst_95 : f32 to vector<16x128xf32>
    %246 = arith.addf %244, %245 : vector<16x128xf32>
    %247 = vector.extract_strided_slice %230 {offsets = [0, 256], sizes = [16, 128], strides = [1, 1]} : vector<16x512xf32> to vector<16x128xf32>
    %248 = math.tanh %247 : vector<16x128xf32>
    %249 = vector.extract_strided_slice %230 {offsets = [0, 384], sizes = [16, 128], strides = [1, 1]} : vector<16x512xf32> to vector<16x128xf32>
    %cst_96 = arith.constant 5.000000e-01 : f32
    %250 = vector.broadcast %cst_96 : f32 to vector<16x128xf32>
    %251 = arith.mulf %250, %249 : vector<16x128xf32>
    %252 = math.tanh %251 : vector<16x128xf32>
    %cst_97 = arith.constant 5.000000e-01 : f32
    %253 = vector.broadcast %cst_97 : f32 to vector<16x128xf32>
    %254 = arith.mulf %253, %252 : vector<16x128xf32>
    %cst_98 = arith.constant 5.000000e-01 : f32
    %255 = vector.broadcast %cst_98 : f32 to vector<16x128xf32>
    %256 = arith.addf %254, %255 : vector<16x128xf32>
    %257 = arith.mulf %246, %217 : vector<16x128xf32>
    %258 = arith.mulf %238, %248 : vector<16x128xf32>
    %259 = arith.addf %257, %258 : vector<16x128xf32>
    %260 = math.tanh %259 : vector<16x128xf32>
    %261 = arith.mulf %256, %260 : vector<16x128xf32>
    %262 = arith.truncf %261 : vector<16x128xf32> to vector<16x128xbf16>
    %263 = arith.index_cast %c5_i32 : i32 to index
    %c0_99 = arith.constant 0 : index
    %c0_100 = arith.constant 0 : index
    %264 = vector.load %arg8[%263, %c0_99, %c0_100] : memref<8x16x128xbf16, #tpu.memory_space<vmem>>, vector<1x16x128xbf16>
    %265 = vector.shape_cast %264 : vector<1x16x128xbf16> to vector<16x128xbf16>
    %266 = vector.shape_cast %262 : vector<16x128xbf16> to vector<1x16x128xbf16>
    tpu.vector_store %arg8[%263, %c0_99, %c0_100], %266 {strides = array<i32>} : memref<8x16x128xbf16, #tpu.memory_space<vmem>>, vector<1x16x128xbf16>,
    %c6_i32 = arith.constant 6 : i32
    %267 = arith.index_cast %c6_i32 : i32 to index
    %c0_101 = arith.constant 0 : index
    %c0_102 = arith.constant 0 : index
    %268 = vector.load %arg11[%267, %c0_101, %c0_102] : memref<8x16x512xf32, #tpu.memory_space<vmem>>, vector<1x16x512xf32>
    %269 = vector.shape_cast %268 : vector<1x16x512xf32> to vector<16x512xf32>
    %270 = arith.truncf %261 : vector<16x128xf32> to vector<16x128xbf16>
    %cst_103 = arith.constant dense<0.000000e+00> : vector<16x512xf32>
    %271 = tpu.matmul %270, %12, %cst_103 {dimension_numbers = #tpu.dot_dimension_numbers<[1], [0], [0], [1], [0, 0, 1, 1], [], []>} : vector<16x128xbf16>, vector<128x512xbf16>, vector<16x512xf32> -> vector<16x512xf32>
    %272 = arith.addf %269, %271 : vector<16x512xf32>
    %273 = vector.extract_strided_slice %272 {offsets = [0, 0], sizes = [16, 128], strides = [1, 1]} : vector<16x512xf32> to vector<16x128xf32>
    %cst_104 = arith.constant 5.000000e-01 : f32
    %274 = vector.broadcast %cst_104 : f32 to vector<16x128xf32>
    %275 = arith.mulf %274, %273 : vector<16x128xf32>
    %276 = math.tanh %275 : vector<16x128xf32>
    %cst_105 = arith.constant 5.000000e-01 : f32
    %277 = vector.broadcast %cst_105 : f32 to vector<16x128xf32>
    %278 = arith.mulf %277, %276 : vector<16x128xf32>
    %cst_106 = arith.constant 5.000000e-01 : f32
    %279 = vector.broadcast %cst_106 : f32 to vector<16x128xf32>
    %280 = arith.addf %278, %279 : vector<16x128xf32>
    %281 = vector.extract_strided_slice %272 {offsets = [0, 128], sizes = [16, 128], strides = [1, 1]} : vector<16x512xf32> to vector<16x128xf32>
    %cst_107 = arith.constant 5.000000e-01 : f32
    %282 = vector.broadcast %cst_107 : f32 to vector<16x128xf32>
    %283 = arith.mulf %282, %281 : vector<16x128xf32>
    %284 = math.tanh %283 : vector<16x128xf32>
    %cst_108 = arith.constant 5.000000e-01 : f32
    %285 = vector.broadcast %cst_108 : f32 to vector<16x128xf32>
    %286 = arith.mulf %285, %284 : vector<16x128xf32>
    %cst_109 = arith.constant 5.000000e-01 : f32
    %287 = vector.broadcast %cst_109 : f32 to vector<16x128xf32>
    %288 = arith.addf %286, %287 : vector<16x128xf32>
    %289 = vector.extract_strided_slice %272 {offsets = [0, 256], sizes = [16, 128], strides = [1, 1]} : vector<16x512xf32> to vector<16x128xf32>
    %290 = math.tanh %289 : vector<16x128xf32>
    %291 = vector.extract_strided_slice %272 {offsets = [0, 384], sizes = [16, 128], strides = [1, 1]} : vector<16x512xf32> to vector<16x128xf32>
    %cst_110 = arith.constant 5.000000e-01 : f32
    %292 = vector.broadcast %cst_110 : f32 to vector<16x128xf32>
    %293 = arith.mulf %292, %291 : vector<16x128xf32>
    %294 = math.tanh %293 : vector<16x128xf32>
    %cst_111 = arith.constant 5.000000e-01 : f32
    %295 = vector.broadcast %cst_111 : f32 to vector<16x128xf32>
    %296 = arith.mulf %295, %294 : vector<16x128xf32>
    %cst_112 = arith.constant 5.000000e-01 : f32
    %297 = vector.broadcast %cst_112 : f32 to vector<16x128xf32>
    %298 = arith.addf %296, %297 : vector<16x128xf32>
    %299 = arith.mulf %288, %259 : vector<16x128xf32>
    %300 = arith.mulf %280, %290 : vector<16x128xf32>
    %301 = arith.addf %299, %300 : vector<16x128xf32>
    %302 = math.tanh %301 : vector<16x128xf32>
    %303 = arith.mulf %298, %302 : vector<16x128xf32>
    %304 = arith.truncf %303 : vector<16x128xf32> to vector<16x128xbf16>
    %305 = arith.index_cast %c6_i32 : i32 to index
    %c0_113 = arith.constant 0 : index
    %c0_114 = arith.constant 0 : index
    %306 = vector.load %arg8[%305, %c0_113, %c0_114] : memref<8x16x128xbf16, #tpu.memory_space<vmem>>, vector<1x16x128xbf16>
    %307 = vector.shape_cast %306 : vector<1x16x128xbf16> to vector<16x128xbf16>
    %308 = vector.shape_cast %304 : vector<16x128xbf16> to vector<1x16x128xbf16>
    tpu.vector_store %arg8[%305, %c0_113, %c0_114], %308 {strides = array<i32>} : memref<8x16x128xbf16, #tpu.memory_space<vmem>>, vector<1x16x128xbf16>,
    %c7_i32 = arith.constant 7 : i32
    %309 = arith.index_cast %c7_i32 : i32 to index
    %c0_115 = arith.constant 0 : index
    %c0_116 = arith.constant 0 : index
    %310 = vector.load %arg11[%309, %c0_115, %c0_116] : memref<8x16x512xf32, #tpu.memory_space<vmem>>, vector<1x16x512xf32>
    %311 = vector.shape_cast %310 : vector<1x16x512xf32> to vector<16x512xf32>
    %312 = arith.truncf %303 : vector<16x128xf32> to vector<16x128xbf16>
    %cst_117 = arith.constant dense<0.000000e+00> : vector<16x512xf32>
    %313 = tpu.matmul %312, %12, %cst_117 {dimension_numbers = #tpu.dot_dimension_numbers<[1], [0], [0], [1], [0, 0, 1, 1], [], []>} : vector<16x128xbf16>, vector<128x512xbf16>, vector<16x512xf32> -> vector<16x512xf32>
    %314 = arith.addf %311, %313 : vector<16x512xf32>
    %315 = vector.extract_strided_slice %314 {offsets = [0, 0], sizes = [16, 128], strides = [1, 1]} : vector<16x512xf32> to vector<16x128xf32>
    %cst_118 = arith.constant 5.000000e-01 : f32
    %316 = vector.broadcast %cst_118 : f32 to vector<16x128xf32>
    %317 = arith.mulf %316, %315 : vector<16x128xf32>
    %318 = math.tanh %317 : vector<16x128xf32>
    %cst_119 = arith.constant 5.000000e-01 : f32
    %319 = vector.broadcast %cst_119 : f32 to vector<16x128xf32>
    %320 = arith.mulf %319, %318 : vector<16x128xf32>
    %cst_120 = arith.constant 5.000000e-01 : f32
    %321 = vector.broadcast %cst_120 : f32 to vector<16x128xf32>
    %322 = arith.addf %320, %321 : vector<16x128xf32>
    %323 = vector.extract_strided_slice %314 {offsets = [0, 128], sizes = [16, 128], strides = [1, 1]} : vector<16x512xf32> to vector<16x128xf32>
    %cst_121 = arith.constant 5.000000e-01 : f32
    %324 = vector.broadcast %cst_121 : f32 to vector<16x128xf32>
    %325 = arith.mulf %324, %323 : vector<16x128xf32>
    %326 = math.tanh %325 : vector<16x128xf32>
    %cst_122 = arith.constant 5.000000e-01 : f32
    %327 = vector.broadcast %cst_122 : f32 to vector<16x128xf32>
    %328 = arith.mulf %327, %326 : vector<16x128xf32>
    %cst_123 = arith.constant 5.000000e-01 : f32
    %329 = vector.broadcast %cst_123 : f32 to vector<16x128xf32>
    %330 = arith.addf %328, %329 : vector<16x128xf32>
    %331 = vector.extract_strided_slice %314 {offsets = [0, 256], sizes = [16, 128], strides = [1, 1]} : vector<16x512xf32> to vector<16x128xf32>
    %332 = math.tanh %331 : vector<16x128xf32>
    %333 = vector.extract_strided_slice %314 {offsets = [0, 384], sizes = [16, 128], strides = [1, 1]} : vector<16x512xf32> to vector<16x128xf32>
    %cst_124 = arith.constant 5.000000e-01 : f32
    %334 = vector.broadcast %cst_124 : f32 to vector<16x128xf32>
    %335 = arith.mulf %334, %333 : vector<16x128xf32>
    %336 = math.tanh %335 : vector<16x128xf32>
    %cst_125 = arith.constant 5.000000e-01 : f32
    %337 = vector.broadcast %cst_125 : f32 to vector<16x128xf32>
    %338 = arith.mulf %337, %336 : vector<16x128xf32>
    %cst_126 = arith.constant 5.000000e-01 : f32
    %339 = vector.broadcast %cst_126 : f32 to vector<16x128xf32>
    %340 = arith.addf %338, %339 : vector<16x128xf32>
    %341 = arith.mulf %330, %301 : vector<16x128xf32>
    %342 = arith.mulf %322, %332 : vector<16x128xf32>
    %343 = arith.addf %341, %342 : vector<16x128xf32>
    %344 = math.tanh %343 : vector<16x128xf32>
    %345 = arith.mulf %340, %344 : vector<16x128xf32>
    %346 = arith.truncf %345 : vector<16x128xf32> to vector<16x128xbf16>
    %347 = arith.index_cast %c7_i32 : i32 to index
    %c0_127 = arith.constant 0 : index
    %c0_128 = arith.constant 0 : index
    %348 = vector.load %arg8[%347, %c0_127, %c0_128] : memref<8x16x128xbf16, #tpu.memory_space<vmem>>, vector<1x16x128xbf16>
    %349 = vector.shape_cast %348 : vector<1x16x128xbf16> to vector<16x128xbf16>
    %350 = vector.shape_cast %346 : vector<16x128xbf16> to vector<1x16x128xbf16>
    tpu.vector_store %arg8[%347, %c0_127, %c0_128], %350 {strides = array<i32>} : memref<8x16x128xbf16, #tpu.memory_space<vmem>>, vector<1x16x128xbf16>,
    %c8_i32 = arith.constant 8 : i32
    %c0_129 = arith.constant 0 : index
    %c0_130 = arith.constant 0 : index
    %351 = vector.load %arg9[%c0_129, %c0_130] : memref<16x128xf32, #tpu.memory_space<vmem>>, vector<16x128xf32>
    tpu.vector_store %arg9[%c0_129, %c0_130], %345 {strides = array<i32>} : memref<16x128xf32, #tpu.memory_space<vmem>>, vector<16x128xf32>,
    %c0_131 = arith.constant 0 : index
    %c0_132 = arith.constant 0 : index
    %352 = vector.load %arg10[%c0_131, %c0_132] : memref<16x128xf32, #tpu.memory_space<vmem>>, vector<16x128xf32>
    tpu.vector_store %arg10[%c0_131, %c0_132], %343 {strides = array<i32>} : memref<16x128xf32, #tpu.memory_space<vmem>>, vector<16x128xf32>,
    return
  }
  func.func @transform_0(%arg0: i32, %arg1: i32) -> (i32, i32, i32) {
    %c0_i32 = arith.constant 0 : i32
    %c0_i32_0 = arith.constant 0 : i32
    return %arg1, %arg0, %c0_i32 : i32, i32, i32
  }
  func.func @transform_1(%arg0: i32, %arg1: i32) -> (i32, i32) {
    %c0_i32 = arith.constant 0 : i32
    %c0_i32_0 = arith.constant 0 : i32
    %c0_i32_1 = arith.constant 0 : i32
    return %c0_i32, %c0_i32_0 : i32, i32
  }
  func.func @transform_2(%arg0: i32, %arg1: i32) -> (i32, i32) {
    %c0_i32 = arith.constant 0 : i32
    %c0_i32_0 = arith.constant 0 : i32
    %c0_i32_1 = arith.constant 0 : i32
    return %c0_i32, %c0_i32_0 : i32, i32
  }
  func.func @transform_3(%arg0: i32, %arg1: i32) -> (i32, i32) {
    %c0_i32 = arith.constant 0 : i32
    %c0_i32_0 = arith.constant 0 : i32
    %c0_i32_1 = arith.constant 0 : i32
    return %c0_i32, %c0_i32_0 : i32, i32
  }
  func.func @transform_4(%arg0: i32, %arg1: i32) -> (i32, i32) {
    %c0_i32 = arith.constant 0 : i32
    %c0_i32_0 = arith.constant 0 : i32
    return %arg0, %c0_i32 : i32, i32
  }
  func.func @transform_5(%arg0: i32, %arg1: i32) -> (i32, i32) {
    %c0_i32 = arith.constant 0 : i32
    %c0_i32_0 = arith.constant 0 : i32
    return %arg0, %c0_i32 : i32, i32
  }
  func.func @transform_6(%arg0: i32, %arg1: i32) -> (i32, i32, i32) {
    %c0_i32 = arith.constant 0 : i32
    %c0_i32_0 = arith.constant 0 : i32
    return %arg1, %arg0, %c0_i32 : i32, i32, i32
  }
  func.func @transform_7(%arg0: i32, %arg1: i32) -> (i32, i32) {
    %c0_i32 = arith.constant 0 : i32
    %c0_i32_0 = arith.constant 0 : i32
    return %arg0, %c0_i32 : i32, i32
  }
  func.func @transform_8(%arg0: i32, %arg1: i32) -> (i32, i32) {
    %c0_i32 = arith.constant 0 : i32
    %c0_i32_0 = arith.constant 0 : i32
    return %arg0, %c0_i32 : i32, i32
  }
}

</mosaic_0001>

<bundles_post_ra>
// kernel: tpu_custom_call.1
= control target key start
LH: loop header
LB: loop body
LE: loop exit
PB: predicated region body
PF: predicated region fallthrough
CT: control target
= control target key end

     0   :  { %6 = vsyncpa [#allocation3], 0  ;;  %s341_s0 = inlined_call_operand.hbm [shape: f32[8,128], index: 0, kind: input, shape index: {}]   ;;  %s342_s1 = inlined_call_operand.hbm [shape: f32[8,128], index: 1, kind: output, shape index: {}]  }
   0x1   :  { %7 = vsyncpa [#allocation4], 0  ;;  %s262_s6 = smov 0  }
   0x2 LB: > { %s145_s7 = sadd.s32 4294967295, %s248_s6   ;;  %p146_p0 = scmp.ge.s32.totalorder %s248_s6, 1  ;;  %s248_s6 = sphi %s262_s6, %s13_s6  }
   0x3   : > { %p60_p1 = scmp.lt.s32.totalorder %s248_s6, 3  ;;  %p276_p3 = scmp.eq.s32.totalorder %s145_s7, 0 }
   0x4   : > { %s250_s10 = smov [#allocation2]   ;;  %s180_s15 = scalar_lea.hbm %s341_s0, 128 }
   0x5   : > { %p270_p2 = pnand %p146_p0, %p60_p1  ;;  %s73_s11 = sshll.u32 %s250_s10, 4  ;;  %s74_s11 = int_to_ptr.vmem [resolvable:$true] %s73_s11 }
   0x6   : > { %s347_s9 = scalar_select %p276_p3, 1, 0 }
   0x7   : > { %s346_s8 = scalar_select %p270_p2, 1, 0 }
   0x8   : > { %p162_p4 = pneg %p270_p2  ;;  %p181_p6 = scmp.ne.s32.totalorder %s341_s0, %s180_s15 }
   0x9   : > { %p187_p10 = scmp.lt.u32.totalorder %s180_s15, %s341_s0 }
   0xa   : > { %p284_p5 = pnand %p276_p3, %p162_p4 }
   0xc   : > { %p182_p7 = pneg %p284_p5 }
   0xe   : > { %p183_p8 = pnand %p182_p7, %p181_p6 }
  0x10   : > { %p184_p9 = pneg %p183_p8 }
  0x12   : > { %p189_p11 = pnand %p187_p10, %p184_p9 }
  0x14   : > { %192 = shalt.err (!%p189_p11)
}
  0x15   : > { %s193_s20 = scalar_lea.vmem %s74_s11, 128  ;;  %p201_p1 = scmp.lt.s32.totalorder %s74_s11, %s74_s11 }
  0x16   : > { %p194_p12 = scmp.ne.s32.totalorder %s74_s11, %s193_s20  ;;  %p202_p4 = scmp.lt.s32.totalorder %s193_s20, %s193_s20 }
  0x18   : > { %p196_p13 = pnand %p194_p12, %p182_p7  ;;  %p203_p3 = por %p202_p4, %p201_p1 }
  0x1a   : > { %p197_p0 = pneg %p196_p13 }
  0x1c   : > { %p204_p2 = pnand %p203_p3, %p197_p0 }
  0x1e   : > { %207 = shalt.err (!%p204_p2)
}
  0x1f   : > { %165 = dma.hbm_to_vmem [thread:$0]  (!%p284_p5), %s341_s0, 128, %s74_s11, [#allocation3]  }
  0x20   : > { %p349_p6 = scmp.ne.s32.totalorder %s346_s8, 0 }
  0x21   : > { %p350_p8 = scmp.ne.s32.totalorder (!%p349_p6), %s347_s9, 0 }
  0x22   : > { %86 = sbr.rel (%p349_p6) target bundleno = 67 (0x43), region = 24 }
  0x29   : > { %239 = dma.done.wait (%p350_p8), [#allocation3], 128  }
  0x2a   : > { %241 = vsyncadd (%p350_p8), [#allocation3], 4294967168  ;;  %s251_s23 = smov [#allocation5]   ;;  %v96_v0 = vld [vmem:[#allocation2] sm:$0xff]  ;;  %p312_p2 = scmp.eq.s32.totalorder %s145_s7, 1 }
  0x2b   : > { %s106_s24 = sshll.u32 %s251_s23, 4  ;;  %v97_v1 = vadd.f32 1.0, %v96_v0  ;;  %s107_s24 = int_to_ptr.vmem [resolvable:$true] %s106_s24 }
  0x2c   : > { %s208_s26 = scalar_lea.vmem %s107_s24, 128  ;;  %p215_p9 = scmp.lt.s32.totalorder %s107_s24, %s107_s24 }
  0x2d   : > { %98 = vst [vmem:[#allocation5] sm:$0xff] %v97_v1  ;;  %p209_p3 = scmp.ne.s32.totalorder %s107_s24, %s208_s26  ;;  %p216_p10 = scmp.lt.s32.totalorder %s208_s26, %s208_s26 }
  0x2f   : > { %p210_p5 = pnand %p209_p3, %p312_p2  ;;  %p217_p11 = por %p216_p10, %p215_p9 }
  0x31   : > { %p211_p7 = pneg %p210_p5 }
  0x33   : > { %p218_p12 = pnand %p217_p11, %p211_p7 }
  0x35   : > { %221 = shalt.err (!%p218_p12)
}
  0x36   : > { %s222_s29 = scalar_lea.hbm %s342_s1, 128 }
  0x37   : > { %p223_p13 = scmp.ne.s32.totalorder %s342_s1, %s222_s29  ;;  %p228_p4 = scmp.lt.u32.totalorder %s222_s29, %s342_s1 }
  0x39   : > { %p224_p0 = pnand %p223_p13, %p312_p2 }
  0x3b   : > { %p225_p1 = pneg %p224_p0 }
  0x3d   : > { %p230_p6 = pnand %p228_p4, %p225_p1 }
  0x3f   : > { %233 = shalt.err (!%p230_p6)
}
  0x40   : > { %159 = dma.vmem_to_hbm [thread:$0]  (%p312_p2), %s107_s24, 128, %s342_s1, [#allocation4]  }
  0x41   : > { %243 = dma.done.wait (%p312_p2), [#allocation4], 128  }
  0x42   : > { %245 = vsyncadd (%p312_p2), [#allocation4], 4294967168 }
  0x43 PF: > { %s13_s6 = sadd.s32 1, %s248_s6  }
  0x44   : > { %p10_p8 = scmp.ge.s32.totalorder %s13_s6, 4  }
  0x46   :  { %12 = sbr.rel (!%p10_p8) target bundleno = 2 (0x2), region = 53 }
  0x4d   :  { %119 = vsyncpa [#allocation3], 1 }
  0x4e   :  { %121 = vsyncpa [#allocation3 + $0x1], 1 }
  0x4f   :  { %122 = vsyncpa [#allocation4], 1 }
  0x50   :  { %124 = vsyncpa [#allocation4 + $0x1], 1 }

// kernel: tpu_custom_call.1
= control target key start
LH: loop header
LB: loop body
LE: loop exit
PB: predicated region body
PF: predicated region fallthrough
CT: control target
= control target key end

     0   :  { %14 = vsyncpa [#allocation4], 0  ;;  %s3630_s0 = inlined_call_operand.hbm [shape: bf16[8,16,128], index: 0, kind: input, shape index: {}]   ;;  %s3631_s1 = inlined_call_operand.hbm [shape: bf16[128,512], index: 1, kind: input, shape index: {}]   ;;  %s3632_s2 = inlined_call_operand.hbm [shape: bf16[128,512], index: 2, kind: input, shape index: {}]   ;;  %s3633_s3 = inlined_call_operand.hbm [shape: f32[1,512], index: 3, kind: input, shape index: {}]   ;;  %s3634_s4 = inlined_call_operand.hbm [shape: f32[16,128], index: 4, kind: input, shape index: {}]   ;;  %s3635_s5 = inlined_call_operand.vmem [shape: f32[16,128], index: 5, kind: input, shape index: {}]   ;;  %s3636_s6 = inlined_call_operand.hbm [shape: bf16[8,16,128], index: 6, kind: output, shape index: {0}]   ;;  %s3637_s7 = inlined_call_operand.hbm [shape: f32[16,128], index: 7, kind: output, shape index: {1}]   ;;  %s3638_s8 = inlined_call_operand.hbm [shape: f32[16,128], index: 8, kind: output, shape index: {2}]  }
   0x1   :  { %15 = vsyncpa [#allocation7], 0 }
   0x2   :  { %16 = vsyncpa [#allocation10], 0 }
   0x3   :  { %17 = vsyncpa [#allocation5], 0 }
   0x4   :  { %18 = vsyncpa [#allocation14], 0  ;;  %s2893_s27 = smov [#allocation6]   ;;  %s2707_s9 = scalar_lea.hbm %s3631_s1, 4096 }
   0x5   :  { %s36_s28 = sshll.u32 %s2893_s27, 4  ;;  %p2708_p0 = scmp.ne.s32.totalorder %s3631_s1, %s2707_s9  ;;  %s37_s28 = int_to_ptr.vmem [resolvable:$true] %s36_s28 }
   0x6   :  { %p2711_p1 = scmp.lt.u32.totalorder %s2707_s9, %s3631_s1 }
   0x8   :  { %p2713_p2 = pnand %p2711_p1, %p2708_p0 }
   0xa   :  { %2716 = shalt.err (!%p2713_p2)
}
   0xb   :  { %s2717_s14 = scalar_lea.vmem %s37_s28, 4096  ;;  %p2722_p4 = scmp.lt.s32.totalorder %s37_s28, %s37_s28 }
   0xc   :  { %p2718_p3 = scmp.ne.s32.totalorder %s37_s28, %s2717_s14  ;;  %p2723_p5 = scmp.lt.s32.totalorder %s2717_s14, %s2717_s14 }
   0xe   :  { %p2724_p6 = por %p2723_p5, %p2722_p4 }
  0x10   :  { %p2725_p7 = pnand %p2724_p6, %p2718_p3 }
  0x12   :  { %2728 = shalt.err (!%p2725_p7)
}
  0x13   :  { %s2894_s15 = smov 256   ;;  %s2895_s16 = smov 16  }
  0x14   :  { %42 = dma.hbm_to_vmem [thread:$0]  %s3631_s1, 4096, %s37_s28, [#allocation7], %s2894_s15, %s2894_s15, %s2895_s16  }
  0x15   :  { %s2896_s19 = smov [#allocation9]   ;;  %s2897_s21 = smov [#allocation3]  }
  0x16   :  { %s61_s20 = sshll.u32 %s2896_s19, 4  ;;  %s24_s22 = sshll.u32 %s2897_s21, 4  ;;  %s62_s20 = int_to_ptr.vmem [resolvable:$true] %s61_s20  ;;  %s25_s22 = int_to_ptr.vmem [resolvable:$true] %s24_s22 }
  0x17   :  { %s2729_s25 = scalar_lea.hbm %s3633_s3, 64 }
  0x18   :  { %p2730_p8 = scmp.ne.s32.totalorder %s3633_s3, %s2729_s25  ;;  %p2733_p9 = scmp.lt.u32.totalorder %s2729_s25, %s3633_s3 }
  0x1a   :  { %p2735_p10 = pnand %p2733_p9, %p2730_p8 }
  0x1c   :  { %2738 = shalt.err (!%p2735_p10)
}
  0x1d   :  { %s2739_s1 = scalar_lea.vmem %s62_s20, 64  ;;  %p2744_p12 = scmp.lt.s32.totalorder %s62_s20, %s62_s20 }
  0x1e   :  { %p2740_p11 = scmp.ne.s32.totalorder %s62_s20, %s2739_s1  ;;  %p2745_p13 = scmp.lt.s32.totalorder %s2739_s1, %s2739_s1 }
  0x20   :  { %p2746_p0 = por %p2745_p13, %p2744_p12 }
  0x22   :  { %p2747_p1 = pnand %p2746_p0, %p2740_p11 }
  0x24   :  { %2750 = shalt.err (!%p2747_p1)
}
  0x25   :  { %64 = dma.hbm_to_vmem [thread:$0]  %s3633_s3, 64, %s62_s20, [#allocation10]  }
  0x26   :  { %s2751_s12 = scalar_lea.hbm %s3630_s0, 1024 }
  0x27   :  { %p2752_p2 = scmp.ne.s32.totalorder %s3630_s0, %s2751_s12  ;;  %p2755_p3 = scmp.lt.u32.totalorder %s2751_s12, %s3630_s0 }
  0x29   :  { %p2757_p4 = pnand %p2755_p3, %p2752_p2 }
  0x2b   :  { %2760 = shalt.err (!%p2757_p4)
}
  0x2c   :  { %s2761_s19 = scalar_lea.vmem %s25_s22, 1024  ;;  %p2766_p6 = scmp.lt.s32.totalorder %s25_s22, %s25_s22 }
  0x2d   :  { %p2762_p5 = scmp.ne.s32.totalorder %s25_s22, %s2761_s19  ;;  %p2767_p7 = scmp.lt.s32.totalorder %s2761_s19, %s2761_s19 }
  0x2f   :  { %p2768_p8 = por %p2767_p7, %p2766_p6 }
  0x31   :  { %p2769_p9 = pnand %p2768_p8, %p2762_p5 }
  0x33   :  { %2772 = shalt.err (!%p2769_p9)
}
  0x34   :  { %s2898_s3 = smov 64   ;;  %s2899_s20 = smov 4  }
  0x35   :  { %30 = dma.hbm_to_vmem [thread:$0]  %s3630_s0, 1024, %s25_s22, [#allocation4], %s2898_s3, %s2898_s3, %s2899_s20  }
  0x36   :  { %s2900_s24 = smov [#allocation8]   ;;  %s2901_s26 = smov [#allocation11]  }
  0x37   :  { %s48_s25 = sshll.u32 %s2900_s24, 4  ;;  %s70_s27 = sshll.u32 %s2901_s26, 4  ;;  %s49_s25 = int_to_ptr.vmem [resolvable:$true] %s48_s25  ;;  %s71_s27 = int_to_ptr.vmem [resolvable:$true] %s70_s27 }
  0x38   :  { %s2773_s1 = scalar_lea.hbm %s3632_s2, 4096 }
  0x39   :  { %p2774_p10 = scmp.ne.s32.totalorder %s3632_s2, %s2773_s1  ;;  %p2777_p11 = scmp.lt.u32.totalorder %s2773_s1, %s3632_s2 }
  0x3b   :  { %p2779_p12 = pnand %p2777_p11, %p2774_p10 }
  0x3d   :  { %2782 = shalt.err (!%p2779_p12)
}
  0x3e   :  { %s2783_s0 = scalar_lea.vmem %s49_s25, 4096  ;;  %p2788_p0 = scmp.lt.s32.totalorder %s49_s25, %s49_s25 }
  0x3f   :  { %p2784_p13 = scmp.ne.s32.totalorder %s49_s25, %s2783_s0  ;;  %p2789_p1 = scmp.lt.s32.totalorder %s2783_s0, %s2783_s0 }
  0x41   :  { %p2790_p2 = por %p2789_p1, %p2788_p0 }
  0x43   :  { %p2791_p3 = pnand %p2790_p2, %p2784_p13 }
  0x45   :  { %2794 = shalt.err (!%p2791_p3)
}
  0x46   :  { %54 = dma.hbm_to_vmem [thread:$0]  %s3632_s2, 4096, %s49_s25, [#allocation7], %s2894_s15, %s2894_s15, %s2895_s16  }
  0x47   :  { %s2795_s17 = scalar_lea.hbm %s3634_s4, 256 }
  0x48   :  { %p2796_p4 = scmp.ne.s32.totalorder %s3634_s4, %s2795_s17  ;;  %p2799_p5 = scmp.lt.u32.totalorder %s2795_s17, %s3634_s4 }
  0x4a   :  { %p2801_p6 = pnand %p2799_p5, %p2796_p4 }
  0x4c   :  { %2804 = shalt.err (!%p2801_p6)
}
  0x4d   :  { %s2805_s24 = scalar_lea.vmem %s71_s27, 256  ;;  %p2810_p8 = scmp.lt.s32.totalorder %s71_s27, %s71_s27 }
  0x4e   :  { %p2806_p7 = scmp.ne.s32.totalorder %s71_s27, %s2805_s24  ;;  %p2811_p9 = scmp.lt.s32.totalorder %s2805_s24, %s2805_s24 }
  0x50   :  { %p2812_p10 = por %p2811_p9, %p2810_p8 }
  0x52   :  { %p2813_p11 = pnand %p2812_p10, %p2806_p7 }
  0x54   :  { %2816 = shalt.err (!%p2813_p11)
}
  0x55   :  { %s2902_s2 = smov 128   ;;  %s2903_s15 = smov 8  }
  0x56   :  { %76 = dma.hbm_to_vmem [thread:$0]  %s3634_s4, 256, %s71_s27, [#allocation10], %s2902_s2, %s2902_s2, %s2903_s15  }
  0x57   :  { %2883 = dma.done.wait [#allocation4], 1024  }
  0x58   :  { %2884 = vsyncadd [#allocation4], 4294966272 }
  0x59   :  { %2885 = dma.done.wait [#allocation7], 8192  }
  0x5a   :  { %2886 = vsyncadd [#allocation7], 4294959104 }
  0x5b   :  { %2887 = dma.done.wait [#allocation10], 320  }
  0x5c   :  { %2888 = vsyncadd [#allocation10], 4294966976  ;;  %v2904_v0 = vmov 0   ;;  %v2411_v1 = vld [vmem:[#allocation6 + $0x4] ss:$16 sps:$4 sm:$0xff]   ;;  %v2465_v43 = vld [vmem:[#allocation3 + $0x8] sm:$0xff]  }
  0x5d   :  { %417 = vmatprep.mubr.bf16.mxu0 %v2904_v0  ;;  %530 = vmatprep.mubr.bf16.mxu1 %v2904_v0  ;;  %v2413_v2 = vld [vmem:[#allocation6 + $0xc] ss:$16 sps:$4 sm:$0xff]   ;;  %v2415_v3 = vld [vmem:[#allocation6] ss:$16 sps:$4 sm:$0xff]   ;;  %v2416_v4 = vld [vmem:[#allocation6 + $0x8] ss:$16 sps:$4 sm:$0xff]  }
  0x5e   :  { %385 = vmatprep.subr.bf16.mxu0 %v2411_v1  ;;  %498 = vmatprep.subr.bf16.mxu1 %v2413_v2  ;;  %v2417_v5 = vld [vmem:[#allocation6 + $0x24] ss:$16 sps:$4 sm:$0xff]   ;;  %v2419_v6 = vld [vmem:[#allocation6 + $0x2c] ss:$16 sps:$4 sm:$0xff]   ;;  %v2421_v7 = vld [vmem:[#allocation6 + $0x20] ss:$16 sps:$4 sm:$0xff]  }
  0x5f   :  { %386 = vmatpush1.bf16.msra.mxu0 %v2415_v3  ;;  %499 = vmatpush1.bf16.msra.mxu1 %v2416_v4  ;;  %v2422_v8 = vld [vmem:[#allocation6 + $0x28] ss:$16 sps:$4 sm:$0xff]   ;;  %v2423_v9 = vld [vmem:[#allocation6 + $0x44] ss:$16 sps:$4 sm:$0xff]   ;;  %v2425_v10 = vld [vmem:[#allocation6 + $0x4c] ss:$16 sps:$4 sm:$0xff]  }
  0x60   :  { %387 = vmatprep.subr.bf16.mxu0 %v2417_v5  ;;  %500 = vmatprep.subr.bf16.mxu1 %v2419_v6  ;;  %v2427_v11 = vld [vmem:[#allocation6 + $0x40] ss:$16 sps:$4 sm:$0xff]   ;;  %v2428_v12 = vld [vmem:[#allocation6 + $0x48] ss:$16 sps:$4 sm:$0xff]   ;;  %v2429_v13 = vld [vmem:[#allocation6 + $0x64] ss:$16 sps:$4 sm:$0xff]  }
  0x61   :  { %v2431_v14 = vld [vmem:[#allocation6 + $0x6c] ss:$16 sps:$4 sm:$0xff]   ;;  %v2433_v15 = vld [vmem:[#allocation6 + $0x60] ss:$16 sps:$4 sm:$0xff]   ;;  %v2434_v16 = vld [vmem:[#allocation6 + $0x68] ss:$16 sps:$4 sm:$0xff]  }
  0x62   :  { %v2435_v17 = vld [vmem:[#allocation6 + $0x84] ss:$16 sps:$4 sm:$0xff]   ;;  %v2437_v18 = vld [vmem:[#allocation6 + $0x8c] ss:$16 sps:$4 sm:$0xff]   ;;  %v2439_v19 = vld [vmem:[#allocation6 + $0x80] ss:$16 sps:$4 sm:$0xff]  }
  0x63   :  { %388 = vmatpush1.bf16.msra.mxu0 %v2421_v7  ;;  %501 = vmatpush1.bf16.msra.mxu1 %v2422_v8  ;;  %v2440_v20 = vld [vmem:[#allocation6 + $0x88] ss:$16 sps:$4 sm:$0xff]   ;;  %v2441_v21 = vld [vmem:[#allocation6 + $0xa4] ss:$16 sps:$4 sm:$0xff]   ;;  %v2443_v22 = vld [vmem:[#allocation6 + $0xac] ss:$16 sps:$4 sm:$0xff]  }
  0x64   :  { %389 = vmatprep.subr.bf16.mxu0 %v2423_v9  ;;  %502 = vmatprep.subr.bf16.mxu1 %v2425_v10  ;;  %v2445_v23 = vld [vmem:[#allocation6 + $0xa0] ss:$16 sps:$4 sm:$0xff]   ;;  %v2446_v24 = vld [vmem:[#allocation6 + $0xa8] ss:$16 sps:$4 sm:$0xff]   ;;  %v2447_v25 = vld [vmem:[#allocation6 + $0xc4] ss:$16 sps:$4 sm:$0xff]  }
  0x65   :  { %v2449_v26 = vld [vmem:[#allocation6 + $0xcc] ss:$16 sps:$4 sm:$0xff]   ;;  %v2451_v27 = vld [vmem:[#allocation6 + $0xc0] ss:$16 sps:$4 sm:$0xff]   ;;  %v2452_v28 = vld [vmem:[#allocation6 + $0xc8] ss:$16 sps:$4 sm:$0xff]  }
  0x66   :  { %v2453_v29 = vld [vmem:[#allocation6 + $0xe4] ss:$16 sps:$4 sm:$0xff]   ;;  %v2455_v30 = vld [vmem:[#allocation6 + $0xec] ss:$16 sps:$4 sm:$0xff]   ;;  %v2457_v31 = vld [vmem:[#allocation6 + $0xe0] ss:$16 sps:$4 sm:$0xff]  }
  0x67   :  { %390 = vmatpush1.bf16.msra.mxu0 %v2427_v11  ;;  %503 = vmatpush1.bf16.msra.mxu1 %v2428_v12  ;;  %v2458_v32 = vld [vmem:[#allocation6 + $0xe8] ss:$16 sps:$4 sm:$0xff]   ;;  %v3027_v33 = vld [vmem:[#allocation8 + $0x4] ss:$16 sps:$4 sm:$0xff]   ;;  %v3029_v34 = vld [vmem:[#allocation8 + $0xc] ss:$16 sps:$4 sm:$0xff]  }
  0x68   :  { %391 = vmatprep.subr.bf16.mxu0 %v2429_v13  ;;  %504 = vmatprep.subr.bf16.mxu1 %v2431_v14  ;;  %v2459_v35 = vld [vmem:[#allocation3] sm:$0xff]   ;;  %v3037_v38 = vld [vmem:[#allocation8 + $0x8] ss:$16 sps:$4 sm:$0xff]   ;;  %v3039_v39 = vld [vmem:[#allocation8 + $0x2c] ss:$16 sps:$4 sm:$0xff]   ;;  %v157_v13 = vlaneseq  ;;  %s2906_s1 = smov [#allocation15]  }
  0x69   :  { %v3031_v36 = vld [vmem:[#allocation8] ss:$16 sps:$4 sm:$0xff]   ;;  %v3035_v37 = vld [vmem:[#allocation8 + $0x24] ss:$16 sps:$4 sm:$0xff]   ;;  %v3050_v42 = vld [vmem:[#allocation8 + $0x28] ss:$16 sps:$4 sm:$0xff]  }
  0x6a   :  { %v3043_v40 = vld [vmem:[#allocation8 + $0x20] ss:$16 sps:$4 sm:$0xff]   ;;  %v3047_v41 = vld [vmem:[#allocation8 + $0x44] ss:$16 sps:$4 sm:$0xff]   ;;  %v3057_v45 = vld [vmem:[#allocation8 + $0x4c] ss:$16 sps:$4 sm:$0xff]  }
  0x6b   :  { %392 = vmatpush1.bf16.msra.mxu0 %v2433_v15  ;;  %505 = vmatpush1.bf16.msra.mxu1 %v2434_v16  ;;  %v3055_v44 = vld [vmem:[#allocation8 + $0x40] ss:$16 sps:$4 sm:$0xff]   ;;  %v3059_v46 = vld [vmem:[#allocation8 + $0x64] ss:$16 sps:$4 sm:$0xff]   ;;  %v3062_v47 = vld [vmem:[#allocation8 + $0x48] ss:$16 sps:$4 sm:$0xff]  }
  0x6c   :  { %393 = vmatprep.subr.bf16.mxu0 %v2435_v17  ;;  %506 = vmatprep.subr.bf16.mxu1 %v2437_v18  ;;  %v3064_v48 = vld [vmem:[#allocation8 + $0x6c] ss:$16 sps:$4 sm:$0xff]   ;;  %v3070_v49 = vld [vmem:[#allocation8 + $0x60] ss:$16 sps:$4 sm:$0xff]   ;;  %v3072_v50 = vld [vmem:[#allocation8 + $0x84] ss:$16 sps:$4 sm:$0xff]  }
  0x6d   :  { %v3076_v51 = vld [vmem:[#allocation8 + $0x68] ss:$16 sps:$4 sm:$0xff]   ;;  %v2472_v52 = vld [vmem:[#allocation3 + $0x10] sm:$0xff]   ;;  %v3082_v54 = vld [vmem:[#allocation8 + $0x8c] ss:$16 sps:$4 sm:$0xff]   ;;  %v158_v14 = vshrl.u32 %v157_v13, 7 }
  0x6e   :  { %v3079_v53 = vld [vmem:[#allocation8 + $0x80] ss:$16 sps:$4 sm:$0xff]   ;;  %v3086_v55 = vld [vmem:[#allocation8 + $0xa4] ss:$16 sps:$4 sm:$0xff]   ;;  %v3088_v56 = vld [vmem:[#allocation8 + $0x88] ss:$16 sps:$4 sm:$0xff]  }
  0x6f   :  { %394 = vmatpush1.bf16.msra.mxu0 %v2439_v19  ;;  %507 = vmatpush1.bf16.msra.mxu1 %v2440_v20  ;;  %v3090_v57 = vld [vmem:[#allocation8 + $0xac] ss:$16 sps:$4 sm:$0xff]   ;;  %v3096_v58 = vld [vmem:[#allocation8 + $0xa0] ss:$16 sps:$4 sm:$0xff]   ;;  %v3100_v59 = vld [vmem:[#allocation8 + $0xc4] ss:$16 sps:$4 sm:$0xff]  }
  0x70   :  { %395 = vmatprep.subr.bf16.mxu0 %v2441_v21  ;;  %508 = vmatprep.subr.bf16.mxu1 %v2443_v22  ;;  %v3102_v60 = vld [vmem:[#allocation8 + $0xa8] ss:$16 sps:$4 sm:$0xff]   ;;  %v3106_v62 = vld [vmem:[#allocation8 + $0xc0] ss:$16 sps:$4 sm:$0xff]   ;;  %v3108_v63 = vld [vmem:[#allocation8 + $0xcc] ss:$16 sps:$4 sm:$0xff]  }
  0x71   :  { %v2479_v61 = vld [vmem:[#allocation3 + $0x18] sm:$0xff]   ;;  %v3112_v1 = vld [vmem:[#allocation8 + $0xe4] ss:$16 sps:$4 sm:$0xff]   ;;  %v3122_v4 = vld [vmem:[#allocation8 + $0xe0] ss:$16 sps:$4 sm:$0xff]   ;;  %v159_v15 = vsub.s32 0, %v158_v14 }
  0x72   :  { %v3114_v2 = vld [vmem:[#allocation8 + $0xc8] ss:$16 sps:$4 sm:$0xff]   ;;  %v3116_v3 = vld [vmem:[#allocation8 + $0xec] ss:$16 sps:$4 sm:$0xff]   ;;  %v2486_v6 = vld [vmem:[#allocation3 + $0x20] sm:$0xff]   ;;  %v163_v17 = vsub.s32 1, %v158_v14 }
  0x73   :  { %396 = vmatpush1.bf16.msra.mxu0 %v2445_v23  ;;  %509 = vmatpush1.bf16.msra.mxu1 %v2446_v24  ;;  %v3126_v5 = vld [vmem:[#allocation8 + $0xe8] ss:$16 sps:$4 sm:$0xff]   ;;  %v2500_v8 = vld [vmem:[#allocation3 + $0x30] sm:$0xff]   ;;  %v155_v16 = vld [vmem:[#allocation9] sm:$0xf]  ;;  %v167_v19 = vsub.s32 2, %v158_v14 }
  0x74   :  { %397 = vmatprep.subr.bf16.mxu0 %v2447_v25  ;;  %510 = vmatprep.subr.bf16.mxu1 %v2449_v26  ;;  %v2493_v7 = vld [vmem:[#allocation3 + $0x28] sm:$0xff]   ;;  %v2507_v9 = vld [vmem:[#allocation3 + $0x38] sm:$0xff]   ;;  %v3175_v18 = vrot.slane %v155_v16, %v159_v15  ;;  %v3177_v20 = vrot.slane %v155_v16, %v163_v17  ;;  %s2103_s28 = sshll.u32 %s2906_s1, 4  ;;  %s2907_s9 = smov [#allocation12]   ;;  %s3571_s28 = int_to_ptr.vmem [resolvable:$true] %s2103_s28 }
  0x75   :  { %v99_v10 = vld [vmem:[#allocation11] sm:$0xff]  ;;  %v100_v11 = vld [vmem:[#allocation11 + $0x8] sm:$0xff]  ;;  %v3180_v24 = vrot.slane %v155_v16, %v167_v19  ;;  %s2079_s10 = sshll.u32 %s2907_s9, 4  ;;  %s3573_s10 = int_to_ptr.vmem [resolvable:$true] %s2079_s10 }
  0x76   :  { %v719_v12 = vpack.c.bf16 %v100_v11, %v99_v10 }
  0x77   :  { %398 = vmatpush1.bf16.msra.mxu0 %v2451_v27  ;;  %511 = vmatpush1.bf16.msra.mxu1 %v2452_v28 }
  0x78   :  { %399 = vmatprep.subr.bf16.mxu0 %v2453_v29  ;;  %512 = vmatprep.subr.bf16.mxu1 %v2455_v30 }
  0x7b   :  { %400 = vmatpush1.bf16.msra.mxu0 %v2457_v31  ;;  %513 = vmatpush1.bf16.msra.mxu1 %v2458_v32 }
  0x7c   :  { %880 = vmatprep.subr.bf16.mxu0 %v3027_v33  ;;  %923 = vmatprep.subr.bf16.mxu1 %v3029_v34 }
  0x7e   :  { %418 = vmatmul.mubr.bf16.vlgmr.msra.gmra.mrb[0].mxu0 %v2459_v35  ;;  %531 = vmatmul.mubr.bf16.vlgmr.msra.gmra.mrb[0].mxu1 %v2459_v35 }
  0x7f   :  { %881 = vmatpush1.bf16.msra.mxu0 %v3031_v36  ;;  %427 = vmatprep.mubr.bf16.mxu0 %v2904_v0 }
  0x80   :  { %540 = vmatprep.mubr.bf16.mxu1 %v2904_v0  ;;  %882 = vmatprep.subr.bf16.mxu0 %v3035_v37 }
  0x81   :  { %924 = vmatpush1.bf16.msra.mxu1 %v3037_v38 }
  0x82   :  { %925 = vmatprep.subr.bf16.mxu1 %v3039_v39 }
  0x83   :  { %883 = vmatpush1.bf16.msra.mxu0 %v3043_v40 }
  0x84   :  { %884 = vmatprep.subr.bf16.mxu0 %v3047_v41 }
  0x85   :  { %926 = vmatpush1.bf16.msra.mxu1 %v3050_v42 }
  0x86   :  { %428 = vmatmul.mubr.bf16.gmra.mrb[4].mxu0 %v2465_v43  ;;  %541 = vmatmul.mubr.bf16.gmra.mrb[4].mxu1 %v2465_v43 }
  0x87   :  { %437 = vmatprep.mubr.bf16.mxu0 %v2904_v0  ;;  %550 = vmatprep.mubr.bf16.mxu1 %v2904_v0 }
  0x88   :  { %885 = vmatpush1.bf16.msra.mxu0 %v3055_v44  ;;  %927 = vmatprep.subr.bf16.mxu1 %v3057_v45 }
  0x89   :  { %886 = vmatprep.subr.bf16.mxu0 %v3059_v46  ;;  %928 = vmatpush1.bf16.msra.mxu1 %v3062_v47 }
  0x8a   :  { %929 = vmatprep.subr.bf16.mxu1 %v3064_v48 }
  0x8c   :  { %887 = vmatpush1.bf16.msra.mxu0 %v3070_v49 }
  0x8d   :  { %888 = vmatprep.subr.bf16.mxu0 %v3072_v50  ;;  %930 = vmatpush1.bf16.msra.mxu1 %v3076_v51 }
  0x8e   :  { %438 = vmatmul.mubr.bf16.gmra.mrb[8].mxu0 %v2472_v52  ;;  %551 = vmatmul.mubr.bf16.gmra.mrb[8].mxu1 %v2472_v52  ;;  %v171_v52 = vsub.s32 3, %v158_v14 }
  0x8f   :  { %447 = vmatprep.mubr.bf16.mxu0 %v2904_v0  ;;  %560 = vmatprep.mubr.bf16.mxu1 %v2904_v0 }
  0x90   :  { %889 = vmatpush1.bf16.msra.mxu0 %v3079_v53  ;;  %931 = vmatprep.subr.bf16.mxu1 %v3082_v54 }
  0x91   :  { %890 = vmatprep.subr.bf16.mxu0 %v3086_v55  ;;  %932 = vmatpush1.bf16.msra.mxu1 %v3088_v56 }
  0x92   :  { %933 = vmatprep.subr.bf16.mxu1 %v3090_v57 }
  0x94   :  { %891 = vmatpush1.bf16.msra.mxu0 %v3096_v58 }
  0x95   :  { %892 = vmatprep.subr.bf16.mxu0 %v3100_v59  ;;  %934 = vmatpush1.bf16.msra.mxu1 %v3102_v60 }
  0x96   :  { %448 = vmatmul.mubr.bf16.gmra.mrb[12].mxu0 %v2479_v61  ;;  %561 = vmatmul.mubr.bf16.gmra.mrb[12].mxu1 %v2479_v61 }
  0x97   :  { %457 = vmatprep.mubr.bf16.mxu0 %v2904_v0  ;;  %570 = vmatprep.mubr.bf16.mxu1 %v2904_v0 }
  0x98   :  { %893 = vmatpush1.bf16.msra.mxu0 %v3106_v62  ;;  %935 = vmatprep.subr.bf16.mxu1 %v3108_v63 }
  0x99   :  { %894 = vmatprep.subr.bf16.mxu0 %v3112_v1  ;;  %936 = vmatpush1.bf16.msra.mxu1 %v3114_v2 }
  0x9a   :  { %937 = vmatprep.subr.bf16.mxu1 %v3116_v3 }
  0x9c   :  { %895 = vmatpush1.bf16.msra.mxu0 %v3122_v4 }
  0x9d   :  { %938 = vmatpush1.bf16.msra.mxu1 %v3126_v5  ;;  %1029 = vmatprep.subr.bf16.mxu0 %v3027_v33 }
  0x9e   :  { %458 = vmatmul.mubr.bf16.gmra.mrb[16].mxu0 %v2486_v6  ;;  %571 = vmatmul.mubr.bf16.gmra.mrb[16].mxu1 %v2486_v6 }
  0x9f   :  { %467 = vmatprep.mubr.bf16.mxu0 %v2904_v0  ;;  %580 = vmatprep.mubr.bf16.mxu1 %v2904_v0 }
  0xa0   :  { %1072 = vmatprep.subr.bf16.mxu1 %v3029_v34 }
  0xa6   :  { %468 = vmatmul.mubr.bf16.gmra.mrb[20].mxu0 %v2493_v7  ;;  %581 = vmatmul.mubr.bf16.gmra.mrb[20].mxu1 %v2493_v7 }
  0xa7   :  { %477 = vmatprep.mubr.bf16.mxu0 %v2904_v0  ;;  %590 = vmatprep.mubr.bf16.mxu1 %v2904_v0 }
  0xae   :  { %478 = vmatmul.mubr.bf16.gmra.mrb[24].mxu0 %v2500_v8  ;;  %591 = vmatmul.mubr.bf16.gmra.mrb[24].mxu1 %v2500_v8 }
  0xaf   :  { %487 = vmatprep.mubr.bf16.mxu0 %v2904_v0  ;;  %600 = vmatprep.mubr.bf16.mxu1 %v2904_v0 }
  0xb6   :  { %488 = vmatmul.mubr.bf16.gmra.mrb[28].mxu0 %v2507_v9  ;;  %601 = vmatmul.mubr.bf16.gmra.mrb[28].mxu1 %v2507_v9  ;;  %v3186_v9 = vrot.slane %v155_v16, %v171_v52  ;;  %v103_v16 = vld [vmem:[%s3635_s5] sm:$0xff] }
  0xb7   :  { %912 = vmatprep.mubr.bf16.mxu0 %v2904_v0  ;;  %955 = vmatprep.mubr.bf16.mxu1 %v2904_v0 }
  0xbe   :  { %913 = vmatmul.mubr.bf16.vlgmr.msra.gmra.mrb[0].mxu0 %v719_v12  ;;  %956 = vmatmul.mubr.bf16.vlgmr.msra.gmra.mrb[0].mxu1 %v719_v12 }
  0xbf   :  { %1030 = vmatpush1.bf16.msra.mxu0 %v3031_v36  ;;  %1073 = vmatpush1.bf16.msra.mxu1 %v3037_v38 }
  0xc0   :  { %1031 = vmatprep.subr.bf16.mxu0 %v3035_v37  ;;  %1074 = vmatprep.subr.bf16.mxu1 %v3039_v39 }
  0xc1   :  { %1061 = vmatprep.mubr.bf16.mxu0 %v2904_v0  ;;  %1104 = vmatprep.mubr.bf16.mxu1 %v2904_v0 }
  0xc3   :  { %1032 = vmatpush1.bf16.msra.mxu0 %v3043_v40  ;;  %1075 = vmatpush1.bf16.msra.mxu1 %v3050_v42 }
  0xc4   :  { %1033 = vmatprep.subr.bf16.mxu0 %v3047_v41  ;;  %1076 = vmatprep.subr.bf16.mxu1 %v3057_v45 }
  0xc7   :  { %1034 = vmatpush1.bf16.msra.mxu0 %v3055_v44  ;;  %1077 = vmatpush1.bf16.msra.mxu1 %v3062_v47 }
  0xc8   :  { %1035 = vmatprep.subr.bf16.mxu0 %v3059_v46  ;;  %1078 = vmatprep.subr.bf16.mxu1 %v3064_v48 }
  0xcb   :  { %1036 = vmatpush1.bf16.msra.mxu0 %v3070_v49  ;;  %1079 = vmatpush1.bf16.msra.mxu1 %v3076_v51 }
  0xcc   :  { %1037 = vmatprep.subr.bf16.mxu0 %v3072_v50  ;;  %1080 = vmatprep.subr.bf16.mxu1 %v3082_v54 }
  0xcf   :  { %1038 = vmatpush1.bf16.msra.mxu0 %v3079_v53  ;;  %1081 = vmatpush1.bf16.msra.mxu1 %v3088_v56 }
  0xd0   :  { %1039 = vmatprep.subr.bf16.mxu0 %v3086_v55  ;;  %1082 = vmatprep.subr.bf16.mxu1 %v3090_v57 }
  0xd3   :  { %1040 = vmatpush1.bf16.msra.mxu0 %v3096_v58  ;;  %1083 = vmatpush1.bf16.msra.mxu1 %v3102_v60 }
  0xd4   :  { %1041 = vmatprep.subr.bf16.mxu0 %v3100_v59  ;;  %1084 = vmatprep.subr.bf16.mxu1 %v3108_v63 }
  0xd7   :  { %1042 = vmatpush1.bf16.msra.mxu0 %v3106_v62  ;;  %1085 = vmatpush1.bf16.msra.mxu1 %v3114_v2 }
  0xd8   :  { %1043 = vmatprep.subr.bf16.mxu0 %v3112_v1  ;;  %1086 = vmatprep.subr.bf16.mxu1 %v3116_v3 }
  0xdb   :  { %1044 = vmatpush1.bf16.msra.mxu0 %v3122_v4  ;;  %1087 = vmatpush1.bf16.msra.mxu1 %v3126_v5 }
  0xdc   :  { %1179 = vmatprep.subr.bf16.mxu0 %v3027_v33  ;;  %1222 = vmatprep.subr.bf16.mxu1 %v3029_v34 }
 0x191   :  { %v914_v21 = vpop.f32.mrb[0].mxu0  ;;  %v957_v22 = vpop.f32.mrb[0].mxu1 }
 0x192   :  { %v2268_v23 = vadd.f32 %v914_v21, %v3175_v18  ;;  %v916_v25 = vpop.f32.mrb[1].mxu0  ;;  %v959_v26 = vpop.f32.mrb[1].mxu1  ;;  %v2300_v6 = vadd.f32 %v957_v22, %v3180_v24 }
 0x193   :  { %v2269_v27 = vadd.f32 %v916_v25, %v3177_v20  ;;  %v918_v28 = vpop.f32.mrb[2].mxu0  ;;  %v961_v29 = vpop.f32.mrb[2].mxu1  ;;  %v2301_v11 = vadd.f32 %v959_v26, %v3186_v9 }
 0x194   :  { %v974_v30 = vmul.f32 0.5, %v2268_v23  ;;  %v2270_v31 = vadd.f32 %v918_v28, %v3175_v18  ;;  %v920_v32 = vpop.f32.mrb[3].mxu0  ;;  %v963_v35 = vpop.f32.mrb[3].mxu1  ;;  %v2302_v10 = vadd.f32 %v961_v29, %v3180_v24 }
 0x195   :  { %v982_v43 = vmul.f32 0.5, %v2269_v27  ;;  %v2271_v61 = vadd.f32 %v920_v32, %v3177_v20  ;;  %v2303_v12 = vadd.f32 %v963_v35, %v3186_v9  ;;  %v992_v17 = vmul.f32 0.5, %v2301_v11 }
 0x196   :  { %2515 = vtanh.f32 %v974_v30  ;;  %v975_v7 = vmul.f32 0.5, %v2270_v31 }
 0x197   :  { %2517 = vtanh.f32 %v982_v43  ;;  %v983_v8 = vmul.f32 0.5, %v2271_v61  ;;  %v993_v21 = vmul.f32 0.5, %v2303_v12  ;;  %v104_v43 = vld [vmem:[%s3635_s5 + $0x8] sm:$0xff]  ;;  %s2905_s5 = smov [#allocation13]  }
 0x198   :  { %2519 = vtanh.f32 %v975_v7  ;;  %s2091_s30 = sshll.u32 %s2905_s5, 4  ;;  %s2092_s30 = int_to_ptr.vmem [resolvable:$true] %s2091_s30 }
 0x199   :  { %2521 = vtanh.f32 %v2300_v6  ;;  %s2817_s11 = scalar_lea.vmem %s2092_s30, 256  ;;  %p2822_p13 = scmp.lt.s32.totalorder %s2092_s30, %s2092_s30 }
 0x19a   :  { %2523 = vtanh.f32 %v983_v8  ;;  %p2818_p12 = scmp.ne.s32.totalorder %s2092_s30, %s2817_s11  ;;  %p2823_p0 = scmp.lt.s32.totalorder %s2817_s11, %s2817_s11 }
 0x19b   :  { %2525 = vtanh.f32 %v2302_v10 }
 0x19c   :  { %2527 = vtanh.f32 %v992_v17  ;;  %p2824_p1 = por %p2823_p0, %p2822_p13 }
 0x19d   :  { %2529 = vtanh.f32 %v993_v21 }
 0x19e   :  { %p2825_p2 = pnand %p2824_p1, %p2818_p12 }
 0x1a0   :  { %v2516_v13 = vpop.eup %2515 }
 0x1a1   :  { %v2518_v14 = vpop.eup %2517  ;;  %v978_v15 = vmul.f32 0.5, %v2516_v13 }
 0x1a2   :  { %v986_v19 = vmul.f32 0.5, %v2518_v14  ;;  %v2520_v22 = vpop.eup %2519 }
 0x1a3   :  { %v980_v23 = vadd.f32 0.5, %v978_v15  ;;  %v2522_v25 = vpop.eup %2521  ;;  %v979_v28 = vmul.f32 0.5, %v2520_v22 }
 0x1a4   :  { %v988_v27 = vadd.f32 0.5, %v986_v19  ;;  %v2524_v29 = vpop.eup %2523 }
 0x1a5   :  { %v1002_v26 = vmul.f32 %v2522_v25, %v980_v23  ;;  %v981_v31 = vadd.f32 0.5, %v979_v28  ;;  %v987_v32 = vmul.f32 0.5, %v2524_v29  ;;  %v2526_v35 = vpop.eup %2525 }
 0x1a6   :  { %v1000_v30 = vmul.f32 %v988_v27, %v103_v16  ;;  %v2528_v10 = vpop.eup %2527 }
 0x1a7   :  { %v989_v61 = vadd.f32 0.5, %v987_v32  ;;  %v1003_v6 = vmul.f32 %v2526_v35, %v981_v31  ;;  %v2530_v11 = vpop.eup %2529  ;;  %v996_v12 = vmul.f32 0.5, %v2528_v10 }
 0x1a8   :  { %v3197_v52 = vadd.f32 %v1002_v26, %v1000_v30  ;;  %v997_v13 = vmul.f32 0.5, %v2530_v11 }
 0x1a9   :  { %v1001_v7 = vmul.f32 %v989_v61, %v104_v43  ;;  %v998_v15 = vadd.f32 0.5, %v996_v12 }
 0x1aa   :  { %2531 = vtanh.f32 %v3197_v52  ;;  %v999_v17 = vadd.f32 0.5, %v997_v13 }
 0x1ab   :  { %v3200_v8 = vadd.f32 %v1003_v6, %v1001_v7 }
 0x1ad   :  { %2533 = vtanh.f32 %v3200_v8 }
 0x1b4   :  { %v2532_v14 = vpop.eup %2531 }
 0x1b5   :  { %v1008_v21 = vmul.f32 %v2532_v14, %v998_v15 }
 0x1b7   :  { %v2534_v19 = vpop.eup %2533 }
 0x1b8   :  { %v1009_v22 = vmul.f32 %v2534_v19, %v999_v17 }
 0x1ba   :  { %v1010_v23 = vpack.c.bf16 %v1009_v22, %v1008_v21 }
 0x1bc   :  { %2232 = vst [vmem:[#allocation12] sm:$0xff] %v1010_v23   ;;  %1062 = vmatmul.mubr.bf16.vlgmr.msra.gmra.mrb[4].mxu0 %v1010_v23  ;;  %1105 = vmatmul.mubr.bf16.vlgmr.msra.gmra.mrb[4].mxu1 %v1010_v23 }
 0x1bd   :  { %1180 = vmatpush1.bf16.msra.mxu0 %v3031_v36  ;;  %1223 = vmatpush1.bf16.msra.mxu1 %v3037_v38 }
 0x1be   :  { %1181 = vmatprep.subr.bf16.mxu0 %v3035_v37  ;;  %1224 = vmatprep.subr.bf16.mxu1 %v3039_v39 }
 0x1bf   :  { %1211 = vmatprep.mubr.bf16.mxu0 %v2904_v0  ;;  %1254 = vmatprep.mubr.bf16.mxu1 %v2904_v0 }
 0x1c1   :  { %1182 = vmatpush1.bf16.msra.mxu0 %v3043_v40  ;;  %1225 = vmatpush1.bf16.msra.mxu1 %v3050_v42 }
 0x1c2   :  { %1183 = vmatprep.subr.bf16.mxu0 %v3047_v41  ;;  %1226 = vmatprep.subr.bf16.mxu1 %v3057_v45 }
 0x1c5   :  { %1184 = vmatpush1.bf16.msra.mxu0 %v3055_v44  ;;  %1227 = vmatpush1.bf16.msra.mxu1 %v3062_v47 }
 0x1c6   :  { %1185 = vmatprep.subr.bf16.mxu0 %v3059_v46  ;;  %1228 = vmatprep.subr.bf16.mxu1 %v3064_v48 }
 0x1c9   :  { %1186 = vmatpush1.bf16.msra.mxu0 %v3070_v49  ;;  %1229 = vmatpush1.bf16.msra.mxu1 %v3076_v51 }
 0x1ca   :  { %1187 = vmatprep.subr.bf16.mxu0 %v3072_v50  ;;  %1230 = vmatprep.subr.bf16.mxu1 %v3082_v54 }
 0x1cd   :  { %1188 = vmatpush1.bf16.msra.mxu0 %v3079_v53  ;;  %1231 = vmatpush1.bf16.msra.mxu1 %v3088_v56 }
 0x1ce   :  { %1189 = vmatprep.subr.bf16.mxu0 %v3086_v55  ;;  %1232 = vmatprep.subr.bf16.mxu1 %v3090_v57 }
 0x1d1   :  { %1190 = vmatpush1.bf16.msra.mxu0 %v3096_v58  ;;  %1233 = vmatpush1.bf16.msra.mxu1 %v3102_v60 }
 0x1d2   :  { %1191 = vmatprep.subr.bf16.mxu0 %v3100_v59  ;;  %1234 = vmatprep.subr.bf16.mxu1 %v3108_v63 }
 0x1d5   :  { %1192 = vmatpush1.bf16.msra.mxu0 %v3106_v62  ;;  %1235 = vmatpush1.bf16.msra.mxu1 %v3114_v2 }
 0x1d6   :  { %1193 = vmatprep.subr.bf16.mxu0 %v3112_v1  ;;  %1236 = vmatprep.subr.bf16.mxu1 %v3116_v3 }
 0x1d9   :  { %1194 = vmatpush1.bf16.msra.mxu0 %v3122_v4  ;;  %1237 = vmatpush1.bf16.msra.mxu1 %v3126_v5 }
 0x1da   :  { %1329 = vmatprep.subr.bf16.mxu0 %v3027_v33  ;;  %1372 = vmatprep.subr.bf16.mxu1 %v3029_v34 }
 0x28f   :  { %v1063_v16 = vpop.f32.mrb[4].mxu0  ;;  %v1106_v25 = vpop.f32.mrb[4].mxu1 }
 0x290   :  { %v2272_v27 = vadd.f32 %v1063_v16, %v3175_v18  ;;  %v1065_v28 = vpop.f32.mrb[5].mxu0  ;;  %v1108_v29 = vpop.f32.mrb[5].mxu1  ;;  %v2304_v10 = vadd.f32 %v1106_v25, %v3180_v24 }
 0x291   :  { %v2273_v26 = vadd.f32 %v1065_v28, %v3177_v20  ;;  %v1067_v30 = vpop.f32.mrb[6].mxu0  ;;  %v1110_v31 = vpop.f32.mrb[6].mxu1  ;;  %v2305_v14 = vadd.f32 %v1108_v29, %v3186_v9 }
 0x292   :  { %v1123_v32 = vmul.f32 0.5, %v2272_v27  ;;  %v2274_v35 = vadd.f32 %v1067_v30, %v3175_v18  ;;  %v1069_v43 = vpop.f32.mrb[7].mxu0  ;;  %v1112_v61 = vpop.f32.mrb[7].mxu1  ;;  %v2306_v13 = vadd.f32 %v1110_v31, %v3180_v24 }
 0x293   :  { %v1131_v6 = vmul.f32 0.5, %v2273_v26  ;;  %v2275_v7 = vadd.f32 %v1069_v43, %v3177_v20  ;;  %v2307_v15 = vadd.f32 %v1112_v61, %v3186_v9  ;;  %v1141_v22 = vmul.f32 0.5, %v2305_v14 }
 0x294   :  { %2535 = vtanh.f32 %v1123_v32  ;;  %v1124_v11 = vmul.f32 0.5, %v2274_v35 }
 0x295   :  { %2537 = vtanh.f32 %v1131_v6  ;;  %v1132_v12 = vmul.f32 0.5, %v2275_v7  ;;  %v1142_v16 = vmul.f32 0.5, %v2307_v15 }
 0x296   :  { %2539 = vtanh.f32 %v1124_v11 }
 0x297   :  { %2541 = vtanh.f32 %v2304_v10 }
 0x298   :  { %2543 = vtanh.f32 %v1132_v12 }
 0x299   :  { %2545 = vtanh.f32 %v2306_v13 }
 0x29a   :  { %2547 = vtanh.f32 %v1141_v22 }
 0x29b   :  { %2549 = vtanh.f32 %v1142_v16 }
 0x29e   :  { %v2536_v17 = vpop.eup %2535 }
 0x29f   :  { %v2538_v19 = vpop.eup %2537  ;;  %v1127_v21 = vmul.f32 0.5, %v2536_v17 }
 0x2a0   :  { %v1135_v23 = vmul.f32 0.5, %v2538_v19  ;;  %v2540_v25 = vpop.eup %2539 }
 0x2a1   :  { %v1129_v27 = vadd.f32 0.5, %v1127_v21  ;;  %v2542_v28 = vpop.eup %2541  ;;  %v1128_v30 = vmul.f32 0.5, %v2540_v25 }
 0x2a2   :  { %v1137_v26 = vadd.f32 0.5, %v1135_v23  ;;  %v2544_v32 = vpop.eup %2543 }
 0x2a3   :  { %v1151_v31 = vmul.f32 %v2542_v28, %v1129_v27  ;;  %v1130_v29 = vadd.f32 0.5, %v1128_v30  ;;  %v1136_v43 = vmul.f32 0.5, %v2544_v32  ;;  %v2546_v61 = vpop.eup %2545 }
 0x2a4   :  { %v1149_v35 = vmul.f32 %v1137_v26, %v3197_v52  ;;  %v2548_v13 = vpop.eup %2547 }
 0x2a5   :  { %v1138_v7 = vadd.f32 0.5, %v1136_v43  ;;  %v1152_v10 = vmul.f32 %v2546_v61, %v1130_v29  ;;  %v2550_v14 = vpop.eup %2549  ;;  %v1145_v15 = vmul.f32 0.5, %v2548_v13 }
 0x2a6   :  { %v3246_v6 = vadd.f32 %v1151_v31, %v1149_v35  ;;  %v1146_v52 = vmul.f32 0.5, %v2550_v14 }
 0x2a7   :  { %v1150_v11 = vmul.f32 %v1138_v7, %v3200_v8  ;;  %v1147_v19 = vadd.f32 0.5, %v1145_v15 }
 0x2a8   :  { %2551 = vtanh.f32 %v3246_v6  ;;  %v1148_v21 = vadd.f32 0.5, %v1146_v52 }
 0x2a9   :  { %v3250_v12 = vadd.f32 %v1152_v10, %v1150_v11 }
 0x2ab   :  { %2553 = vtanh.f32 %v3250_v12 }
 0x2b2   :  { %v2552_v17 = vpop.eup %2551 }
 0x2b3   :  { %v1157_v23 = vmul.f32 %v2552_v17, %v1147_v19 }
 0x2b5   :  { %v2554_v22 = vpop.eup %2553 }
 0x2b6   :  { %v1158_v16 = vmul.f32 %v2554_v22, %v1148_v21 }
 0x2b8   :  { %v1159_v25 = vpack.c.bf16 %v1158_v16, %v1157_v23 }
 0x2ba   :  { %2237 = vst [vmem:[#allocation12 + $0x8] sm:$0xff] %v1159_v25   ;;  %1212 = vmatmul.mubr.bf16.vlgmr.msra.gmra.mrb[8].mxu0 %v1159_v25  ;;  %1255 = vmatmul.mubr.bf16.vlgmr.msra.gmra.mrb[8].mxu1 %v1159_v25 }
 0x2bb   :  { %1330 = vmatpush1.bf16.msra.mxu0 %v3031_v36  ;;  %1373 = vmatpush1.bf16.msra.mxu1 %v3037_v38 }
 0x2bc   :  { %1331 = vmatprep.subr.bf16.mxu0 %v3035_v37  ;;  %1374 = vmatprep.subr.bf16.mxu1 %v3039_v39 }
 0x2bd   :  { %1361 = vmatprep.mubr.bf16.mxu0 %v2904_v0  ;;  %1404 = vmatprep.mubr.bf16.mxu1 %v2904_v0 }
 0x2bf   :  { %1332 = vmatpush1.bf16.msra.mxu0 %v3043_v40  ;;  %1375 = vmatpush1.bf16.msra.mxu1 %v3050_v42 }
 0x2c0   :  { %1333 = vmatprep.subr.bf16.mxu0 %v3047_v41  ;;  %1376 = vmatprep.subr.bf16.mxu1 %v3057_v45 }
 0x2c3   :  { %1334 = vmatpush1.bf16.msra.mxu0 %v3055_v44  ;;  %1377 = vmatpush1.bf16.msra.mxu1 %v3062_v47 }
 0x2c4   :  { %1335 = vmatprep.subr.bf16.mxu0 %v3059_v46  ;;  %1378 = vmatprep.subr.bf16.mxu1 %v3064_v48 }
 0x2c7   :  { %1336 = vmatpush1.bf16.msra.mxu0 %v3070_v49  ;;  %1379 = vmatpush1.bf16.msra.mxu1 %v3076_v51 }
 0x2c8   :  { %1337 = vmatprep.subr.bf16.mxu0 %v3072_v50  ;;  %1380 = vmatprep.subr.bf16.mxu1 %v3082_v54 }
 0x2cb   :  { %1338 = vmatpush1.bf16.msra.mxu0 %v3079_v53  ;;  %1381 = vmatpush1.bf16.msra.mxu1 %v3088_v56 }
 0x2cc   :  { %1339 = vmatprep.subr.bf16.mxu0 %v3086_v55  ;;  %1382 = vmatprep.subr.bf16.mxu1 %v3090_v57 }
 0x2cf   :  { %1340 = vmatpush1.bf16.msra.mxu0 %v3096_v58  ;;  %1383 = vmatpush1.bf16.msra.mxu1 %v3102_v60 }
 0x2d0   :  { %1341 = vmatprep.subr.bf16.mxu0 %v3100_v59  ;;  %1384 = vmatprep.subr.bf16.mxu1 %v3108_v63 }
 0x2d3   :  { %1342 = vmatpush1.bf16.msra.mxu0 %v3106_v62  ;;  %1385 = vmatpush1.bf16.msra.mxu1 %v3114_v2 }
 0x2d4   :  { %1343 = vmatprep.subr.bf16.mxu0 %v3112_v1  ;;  %1386 = vmatprep.subr.bf16.mxu1 %v3116_v3 }
 0x2d7   :  { %1344 = vmatpush1.bf16.msra.mxu0 %v3122_v4  ;;  %1387 = vmatpush1.bf16.msra.mxu1 %v3126_v5 }
 0x2d8   :  { %1479 = vmatprep.subr.bf16.mxu0 %v3027_v33  ;;  %1522 = vmatprep.subr.bf16.mxu1 %v3029_v34 }
 0x38d   :  { %v1213_v8 = vpop.f32.mrb[8].mxu0  ;;  %v1256_v27 = vpop.f32.mrb[8].mxu1 }
 0x38e   :  { %v2276_v28 = vadd.f32 %v1213_v8, %v3175_v18  ;;  %v1215_v26 = vpop.f32.mrb[9].mxu0  ;;  %v1258_v30 = vpop.f32.mrb[9].mxu1  ;;  %v2308_v13 = vadd.f32 %v1256_v27, %v3180_v24 }
 0x38f   :  { %v2277_v32 = vadd.f32 %v1215_v26, %v3177_v20  ;;  %v1217_v31 = vpop.f32.mrb[10].mxu0  ;;  %v1260_v35 = vpop.f32.mrb[10].mxu1  ;;  %v2309_v17 = vadd.f32 %v1258_v30, %v3186_v9 }
 0x390   :  { %v1273_v29 = vmul.f32 0.5, %v2276_v28  ;;  %v2278_v43 = vadd.f32 %v1217_v31, %v3175_v18  ;;  %v1219_v61 = vpop.f32.mrb[11].mxu0  ;;  %v1262_v7 = vpop.f32.mrb[11].mxu1  ;;  %v2310_v52 = vadd.f32 %v1260_v35, %v3180_v24 }
 0x391   :  { %v1281_v10 = vmul.f32 0.5, %v2277_v32  ;;  %v2279_v11 = vadd.f32 %v1219_v61, %v3177_v20  ;;  %v2311_v19 = vadd.f32 %v1262_v7, %v3186_v9  ;;  %v1291_v16 = vmul.f32 0.5, %v2309_v17 }
 0x392   :  { %2555 = vtanh.f32 %v1273_v29  ;;  %v1274_v14 = vmul.f32 0.5, %v2278_v43 }
 0x393   :  { %2557 = vtanh.f32 %v1281_v10  ;;  %v1282_v15 = vmul.f32 0.5, %v2279_v11  ;;  %v1292_v8 = vmul.f32 0.5, %v2311_v19 }
 0x394   :  { %2559 = vtanh.f32 %v1274_v14 }
 0x395   :  { %2561 = vtanh.f32 %v2308_v13 }
 0x396   :  { %2563 = vtanh.f32 %v1282_v15 }
 0x397   :  { %2565 = vtanh.f32 %v2310_v52 }
 0x398   :  { %2567 = vtanh.f32 %v1291_v16 }
 0x399   :  { %2569 = vtanh.f32 %v1292_v8 }
 0x39c   :  { %v2556_v21 = vpop.eup %2555 }
 0x39d   :  { %v2558_v22 = vpop.eup %2557  ;;  %v1277_v23 = vmul.f32 0.5, %v2556_v21 }
 0x39e   :  { %v1285_v25 = vmul.f32 0.5, %v2558_v22  ;;  %v2560_v27 = vpop.eup %2559 }
 0x39f   :  { %v1279_v28 = vadd.f32 0.5, %v1277_v23  ;;  %v2562_v26 = vpop.eup %2561  ;;  %v1278_v31 = vmul.f32 0.5, %v2560_v27 }
 0x3a0   :  { %v1287_v32 = vadd.f32 0.5, %v1285_v25  ;;  %v2564_v29 = vpop.eup %2563 }
 0x3a1   :  { %v1301_v35 = vmul.f32 %v2562_v26, %v1279_v28  ;;  %v1280_v30 = vadd.f32 0.5, %v1278_v31  ;;  %v1286_v61 = vmul.f32 0.5, %v2564_v29  ;;  %v2566_v7 = vpop.eup %2565 }
 0x3a2   :  { %v1299_v43 = vmul.f32 %v1287_v32, %v3246_v6  ;;  %v2568_v52 = vpop.eup %2567 }
 0x3a3   :  { %v1288_v11 = vadd.f32 0.5, %v1286_v61  ;;  %v1302_v13 = vmul.f32 %v2566_v7, %v1280_v30  ;;  %v2570_v17 = vpop.eup %2569  ;;  %v1295_v19 = vmul.f32 0.5, %v2568_v52 }
 0x3a4   :  { %v3296_v10 = vadd.f32 %v1301_v35, %v1299_v43  ;;  %v1296_v6 = vmul.f32 0.5, %v2570_v17 }
 0x3a5   :  { %v1300_v14 = vmul.f32 %v1288_v11, %v3250_v12  ;;  %v1297_v22 = vadd.f32 0.5, %v1295_v19 }
 0x3a6   :  { %2571 = vtanh.f32 %v3296_v10  ;;  %v1298_v23 = vadd.f32 0.5, %v1296_v6 }
 0x3a7   :  { %v3300_v15 = vadd.f32 %v1302_v13, %v1300_v14 }
 0x3a9   :  { %2573 = vtanh.f32 %v3300_v15 }
 0x3b0   :  { %v2572_v21 = vpop.eup %2571 }
 0x3b1   :  { %v1307_v25 = vmul.f32 %v2572_v21, %v1297_v22 }
 0x3b3   :  { %v2574_v16 = vpop.eup %2573 }
 0x3b4   :  { %v1308_v8 = vmul.f32 %v2574_v16, %v1298_v23 }
 0x3b6   :  { %v1309_v27 = vpack.c.bf16 %v1308_v8, %v1307_v25 }
 0x3b8   :  { %2242 = vst [vmem:[#allocation12 + $0x10] sm:$0xff] %v1309_v27   ;;  %1362 = vmatmul.mubr.bf16.vlgmr.msra.gmra.mrb[12].mxu0 %v1309_v27  ;;  %1405 = vmatmul.mubr.bf16.vlgmr.msra.gmra.mrb[12].mxu1 %v1309_v27 }
 0x3b9   :  { %1480 = vmatpush1.bf16.msra.mxu0 %v3031_v36  ;;  %1523 = vmatpush1.bf16.msra.mxu1 %v3037_v38 }
 0x3ba   :  { %1481 = vmatprep.subr.bf16.mxu0 %v3035_v37  ;;  %1524 = vmatprep.subr.bf16.mxu1 %v3039_v39 }
 0x3bb   :  { %1511 = vmatprep.mubr.bf16.mxu0 %v2904_v0  ;;  %1554 = vmatprep.mubr.bf16.mxu1 %v2904_v0 }
 0x3bd   :  { %1482 = vmatpush1.bf16.msra.mxu0 %v3043_v40  ;;  %1525 = vmatpush1.bf16.msra.mxu1 %v3050_v42 }
 0x3be   :  { %1483 = vmatprep.subr.bf16.mxu0 %v3047_v41  ;;  %1526 = vmatprep.subr.bf16.mxu1 %v3057_v45 }
 0x3c1   :  { %1484 = vmatpush1.bf16.msra.mxu0 %v3055_v44  ;;  %1527 = vmatpush1.bf16.msra.mxu1 %v3062_v47 }
 0x3c2   :  { %1485 = vmatprep.subr.bf16.mxu0 %v3059_v46  ;;  %1528 = vmatprep.subr.bf16.mxu1 %v3064_v48 }
 0x3c5   :  { %1486 = vmatpush1.bf16.msra.mxu0 %v3070_v49  ;;  %1529 = vmatpush1.bf16.msra.mxu1 %v3076_v51 }
 0x3c6   :  { %1487 = vmatprep.subr.bf16.mxu0 %v3072_v50  ;;  %1530 = vmatprep.subr.bf16.mxu1 %v3082_v54 }
 0x3c9   :  { %1488 = vmatpush1.bf16.msra.mxu0 %v3079_v53  ;;  %1531 = vmatpush1.bf16.msra.mxu1 %v3088_v56 }
 0x3ca   :  { %1489 = vmatprep.subr.bf16.mxu0 %v3086_v55  ;;  %1532 = vmatprep.subr.bf16.mxu1 %v3090_v57 }
 0x3cd   :  { %1490 = vmatpush1.bf16.msra.mxu0 %v3096_v58  ;;  %1533 = vmatpush1.bf16.msra.mxu1 %v3102_v60 }
 0x3ce   :  { %1491 = vmatprep.subr.bf16.mxu0 %v3100_v59  ;;  %1534 = vmatprep.subr.bf16.mxu1 %v3108_v63 }
 0x3d1   :  { %1492 = vmatpush1.bf16.msra.mxu0 %v3106_v62  ;;  %1535 = vmatpush1.bf16.msra.mxu1 %v3114_v2 }
 0x3d2   :  { %1493 = vmatprep.subr.bf16.mxu0 %v3112_v1  ;;  %1536 = vmatprep.subr.bf16.mxu1 %v3116_v3 }
 0x3d5   :  { %1494 = vmatpush1.bf16.msra.mxu0 %v3122_v4  ;;  %1537 = vmatpush1.bf16.msra.mxu1 %v3126_v5 }
 0x3d6   :  { %1629 = vmatprep.subr.bf16.mxu0 %v3027_v33  ;;  %1672 = vmatprep.subr.bf16.mxu1 %v3029_v34 }
 0x48b   :  { %v1363_v36 = vpop.f32.mrb[12].mxu0  ;;  %v1406_v37 = vpop.f32.mrb[12].mxu1 }
 0x48c   :  { %v2280_v38 = vadd.f32 %v1363_v36, %v3175_v18  ;;  %v1365_v39 = vpop.f32.mrb[13].mxu0  ;;  %v1408_v40 = vpop.f32.mrb[13].mxu1  ;;  %v2312_v34 = vadd.f32 %v1406_v37, %v3180_v24 }
 0x48d   :  { %v2281_v41 = vadd.f32 %v1365_v39, %v3177_v20  ;;  %v1367_v42 = vpop.f32.mrb[14].mxu0  ;;  %v1410_v44 = vpop.f32.mrb[14].mxu1  ;;  %v2313_v32 = vadd.f32 %v1408_v40, %v3186_v9 }
 0x48e   :  { %v1423_v45 = vmul.f32 0.5, %v2280_v38  ;;  %v2282_v46 = vadd.f32 %v1367_v42, %v3175_v18  ;;  %v1369_v47 = vpop.f32.mrb[15].mxu0  ;;  %v1412_v48 = vpop.f32.mrb[15].mxu1  ;;  %v2314_v26 = vadd.f32 %v1410_v44, %v3180_v24 }
 0x48f   :  { %v1431_v50 = vmul.f32 0.5, %v2281_v41  ;;  %v2283_v33 = vadd.f32 %v1369_v47, %v3177_v20  ;;  %v2315_v31 = vadd.f32 %v1412_v48, %v3186_v9  ;;  %v1441_v30 = vmul.f32 0.5, %v2313_v32  ;;  %v3376_v32 = vld [vmem:[#allocation8 + $0x4c] ss:$16 sps:$4 sm:$0xff]  }
 0x490   :  { %2575 = vtanh.f32 %v1423_v45  ;;  %v1424_v12 = vmul.f32 0.5, %v2282_v46 }
 0x491   :  { %2577 = vtanh.f32 %v1431_v50  ;;  %v1432_v28 = vmul.f32 0.5, %v2283_v33  ;;  %v1442_v7 = vmul.f32 0.5, %v2315_v31  ;;  %v3356_v50 = vld [vmem:[#allocation8 + $0x8] ss:$16 sps:$4 sm:$0xff]   ;;  %v3359_v33 = vld [vmem:[#allocation8 + $0x24] ss:$16 sps:$4 sm:$0xff]  }
 0x492   :  { %2579 = vtanh.f32 %v1424_v12  ;;  %v3367_v12 = vld [vmem:[#allocation8 + $0x20] ss:$16 sps:$4 sm:$0xff]  }
 0x493   :  { %2581 = vtanh.f32 %v2312_v34  ;;  %v3362_v34 = vld [vmem:[#allocation8 + $0x2c] ss:$16 sps:$4 sm:$0xff]   ;;  %v3379_v31 = vld [vmem:[#allocation8 + $0x40] ss:$16 sps:$4 sm:$0xff]  }
 0x494   :  { %2583 = vtanh.f32 %v1432_v28  ;;  %v3370_v28 = vld [vmem:[#allocation8 + $0x28] ss:$16 sps:$4 sm:$0xff]  }
 0x495   :  { %2585 = vtanh.f32 %v2314_v26  ;;  %v3373_v26 = vld [vmem:[#allocation8 + $0x44] ss:$16 sps:$4 sm:$0xff]  }
 0x496   :  { %2587 = vtanh.f32 %v1441_v30  ;;  %v3393_v30 = vld [vmem:[#allocation8 + $0x84] ss:$16 sps:$4 sm:$0xff]  }
 0x497   :  { %2589 = vtanh.f32 %v1442_v7 }
 0x49a   :  { %v2576_v29 = vpop.eup %2575 }
 0x49b   :  { %v2578_v35 = vpop.eup %2577  ;;  %v1427_v43 = vmul.f32 0.5, %v2576_v29  ;;  %v3382_v29 = vld [vmem:[#allocation8 + $0x48] ss:$16 sps:$4 sm:$0xff]  }
 0x49c   :  { %v1435_v61 = vmul.f32 0.5, %v2578_v35  ;;  %v2580_v11 = vpop.eup %2579  ;;  %v3385_v35 = vld [vmem:[#allocation8 + $0x64] ss:$16 sps:$4 sm:$0xff]  }
 0x49d   :  { %v1429_v13 = vadd.f32 0.5, %v1427_v43  ;;  %v2582_v14 = vpop.eup %2581  ;;  %v1428_v17 = vmul.f32 0.5, %v2580_v11  ;;  %v3388_v43 = vld [vmem:[#allocation8 + $0x6c] ss:$16 sps:$4 sm:$0xff]  }
 0x49e   :  { %v1437_v52 = vadd.f32 0.5, %v1435_v61  ;;  %v2584_v19 = vpop.eup %2583 }
 0x49f   :  { %v1451_v6 = vmul.f32 %v2582_v14, %v1429_v13  ;;  %v1430_v22 = vadd.f32 0.5, %v1428_v17  ;;  %v1436_v23 = vmul.f32 0.5, %v2584_v19  ;;  %v2586_v16 = vpop.eup %2585 }
 0x4a0   :  { %v1449_v21 = vmul.f32 %v1437_v52, %v3296_v10  ;;  %v2588_v38 = vpop.eup %2587 }
 0x4a1   :  { %v1438_v8 = vadd.f32 0.5, %v1436_v23  ;;  %v1452_v27 = vmul.f32 %v2586_v16, %v1430_v22  ;;  %v2590_v39 = vpop.eup %2589  ;;  %v1445_v40 = vmul.f32 0.5, %v2588_v38 }
 0x4a2   :  { %v3346_v25 = vadd.f32 %v1451_v6, %v1449_v21  ;;  %v1446_v10 = vmul.f32 0.5, %v2590_v39 }
 0x4a3   :  { %v1450_v36 = vmul.f32 %v1438_v8, %v3300_v15  ;;  %v1447_v42 = vadd.f32 0.5, %v1445_v40  ;;  %v3353_v15 = vld [vmem:[#allocation8] ss:$16 sps:$4 sm:$0xff]  }
 0x4a4   :  { %2591 = vtanh.f32 %v3346_v25  ;;  %v1448_v44 = vadd.f32 0.5, %v1446_v10 }
 0x4a5   :  { %v3350_v37 = vadd.f32 %v1452_v27, %v1450_v36 }
 0x4a7   :  { %2593 = vtanh.f32 %v3350_v37 }
 0x4ae   :  { %v2592_v41 = vpop.eup %2591 }
 0x4af   :  { %v1457_v46 = vmul.f32 %v2592_v41, %v1447_v42 }
 0x4b1   :  { %v2594_v45 = vpop.eup %2593 }
 0x4b2   :  { %v1458_v47 = vmul.f32 %v2594_v45, %v1448_v44 }
 0x4b4   :  { %v1459_v48 = vpack.c.bf16 %v1458_v47, %v1457_v46 }
 0x4b6   :  { %2247 = vst [vmem:[#allocation12 + $0x18] sm:$0xff] %v1459_v48   ;;  %1512 = vmatmul.mubr.bf16.vlgmr.msra.gmra.mrb[16].mxu0 %v1459_v48  ;;  %1555 = vmatmul.mubr.bf16.vlgmr.msra.gmra.mrb[16].mxu1 %v1459_v48 }
 0x4b7   :  { %1630 = vmatpush1.bf16.msra.mxu0 %v3353_v15  ;;  %1673 = vmatpush1.bf16.msra.mxu1 %v3356_v50 }
 0x4b8   :  { %1631 = vmatprep.subr.bf16.mxu0 %v3359_v33  ;;  %1674 = vmatprep.subr.bf16.mxu1 %v3362_v34 }
 0x4b9   :  { %1661 = vmatprep.mubr.bf16.mxu0 %v2904_v0  ;;  %1704 = vmatprep.mubr.bf16.mxu1 %v2904_v0 }
 0x4bb   :  { %1632 = vmatpush1.bf16.msra.mxu0 %v3367_v12  ;;  %1675 = vmatpush1.bf16.msra.mxu1 %v3370_v28 }
 0x4bc   :  { %1633 = vmatprep.subr.bf16.mxu0 %v3373_v26  ;;  %1676 = vmatprep.subr.bf16.mxu1 %v3376_v32 }
 0x4bf   :  { %1634 = vmatpush1.bf16.msra.mxu0 %v3379_v31  ;;  %1677 = vmatpush1.bf16.msra.mxu1 %v3382_v29 }
 0x4c0   :  { %1635 = vmatprep.subr.bf16.mxu0 %v3385_v35  ;;  %1678 = vmatprep.subr.bf16.mxu1 %v3388_v43 }
 0x4c3   :  { %1636 = vmatpush1.bf16.msra.mxu0 %v3070_v49  ;;  %1679 = vmatpush1.bf16.msra.mxu1 %v3076_v51  ;;  %v3411_v49 = vld [vmem:[#allocation8 + $0x4] ss:$16 sps:$4 sm:$0xff]   ;;  %v3414_v51 = vld [vmem:[#allocation8 + $0xc] ss:$16 sps:$4 sm:$0xff]  }
 0x4c4   :  { %1637 = vmatprep.subr.bf16.mxu0 %v3393_v30  ;;  %1680 = vmatprep.subr.bf16.mxu1 %v3082_v54 }
 0x4c7   :  { %1638 = vmatpush1.bf16.msra.mxu0 %v3079_v53  ;;  %1681 = vmatpush1.bf16.msra.mxu1 %v3088_v56 }
 0x4c8   :  { %1639 = vmatprep.subr.bf16.mxu0 %v3086_v55  ;;  %1682 = vmatprep.subr.bf16.mxu1 %v3090_v57 }
 0x4cb   :  { %1640 = vmatpush1.bf16.msra.mxu0 %v3096_v58  ;;  %1683 = vmatpush1.bf16.msra.mxu1 %v3102_v60 }
 0x4cc   :  { %1641 = vmatprep.subr.bf16.mxu0 %v3100_v59  ;;  %1684 = vmatprep.subr.bf16.mxu1 %v3108_v63 }
 0x4cf   :  { %1642 = vmatpush1.bf16.msra.mxu0 %v3106_v62  ;;  %1685 = vmatpush1.bf16.msra.mxu1 %v3114_v2 }
 0x4d0   :  { %1643 = vmatprep.subr.bf16.mxu0 %v3112_v1  ;;  %1686 = vmatprep.subr.bf16.mxu1 %v3116_v3 }
 0x4d3   :  { %1644 = vmatpush1.bf16.msra.mxu0 %v3122_v4  ;;  %1687 = vmatpush1.bf16.msra.mxu1 %v3126_v5 }
 0x4d4   :  { %1779 = vmatprep.subr.bf16.mxu0 %v3411_v49  ;;  %1822 = vmatprep.subr.bf16.mxu1 %v3414_v51 }
 0x589   :  { %v1513_v53 = vpop.f32.mrb[16].mxu0  ;;  %v1556_v54 = vpop.f32.mrb[16].mxu1 }
 0x58a   :  { %v2284_v55 = vadd.f32 %v1513_v53, %v3175_v18  ;;  %v1515_v56 = vpop.f32.mrb[17].mxu0  ;;  %v1558_v57 = vpop.f32.mrb[17].mxu1  ;;  %v2316_v5 = vadd.f32 %v1556_v54, %v3180_v24 }
 0x58b   :  { %v2285_v58 = vadd.f32 %v1515_v56, %v3177_v20  ;;  %v1517_v59 = vpop.f32.mrb[18].mxu0  ;;  %v1560_v60 = vpop.f32.mrb[18].mxu1  ;;  %v2317_v13 = vadd.f32 %v1558_v57, %v3186_v9 }
 0x58c   :  { %v1573_v62 = vmul.f32 0.5, %v2284_v55  ;;  %v2286_v63 = vadd.f32 %v1517_v59, %v3175_v18  ;;  %v1519_v1 = vpop.f32.mrb[19].mxu0  ;;  %v1562_v2 = vpop.f32.mrb[19].mxu1  ;;  %v2318_v11 = vadd.f32 %v1560_v60, %v3180_v24 }
 0x58d   :  { %v1581_v3 = vmul.f32 0.5, %v2285_v58  ;;  %v2287_v4 = vadd.f32 %v1519_v1, %v3177_v20  ;;  %v2319_v14 = vadd.f32 %v1562_v2, %v3186_v9  ;;  %v1591_v6 = vmul.f32 0.5, %v2317_v13  ;;  %v3450_v1 = vld [vmem:[#allocation8 + $0x68] ss:$16 sps:$4 sm:$0xff]   ;;  %v3454_v2 = vld [vmem:[#allocation8 + $0x8c] ss:$16 sps:$4 sm:$0xff]  }
 0x58e   :  { %2595 = vtanh.f32 %v1573_v62  ;;  %v1574_v61 = vmul.f32 0.5, %v2286_v63  ;;  %v3475_v13 = vld [vmem:[#allocation8 + $0xc4] ss:$16 sps:$4 sm:$0xff]  }
 0x58f   :  { %2597 = vtanh.f32 %v1581_v3  ;;  %v1582_v7 = vmul.f32 0.5, %v2287_v4  ;;  %v1592_v22 = vmul.f32 0.5, %v2319_v14  ;;  %v3457_v3 = vld [vmem:[#allocation8 + $0x80] ss:$16 sps:$4 sm:$0xff]   ;;  %v3460_v4 = vld [vmem:[#allocation8 + $0x88] ss:$16 sps:$4 sm:$0xff]  }
 0x590   :  { %2599 = vtanh.f32 %v1574_v61  ;;  %v3466_v61 = vld [vmem:[#allocation8 + $0xac] ss:$16 sps:$4 sm:$0xff]  }
 0x591   :  { %2601 = vtanh.f32 %v2316_v5  ;;  %v3463_v5 = vld [vmem:[#allocation8 + $0xa4] ss:$16 sps:$4 sm:$0xff]   ;;  %v3478_v14 = vld [vmem:[#allocation8 + $0xcc] ss:$16 sps:$4 sm:$0xff]  }
 0x592   :  { %2603 = vtanh.f32 %v1582_v7  ;;  %v3469_v7 = vld [vmem:[#allocation8 + $0xa0] ss:$16 sps:$4 sm:$0xff]  }
 0x593   :  { %2605 = vtanh.f32 %v2318_v11  ;;  %v3472_v11 = vld [vmem:[#allocation8 + $0xa8] ss:$16 sps:$4 sm:$0xff]  }
 0x594   :  { %2607 = vtanh.f32 %v1591_v6  ;;  %v3490_v6 = vld [vmem:[#allocation8 + $0xec] ss:$16 sps:$4 sm:$0xff]  }
 0x595   :  { %2609 = vtanh.f32 %v1592_v22  ;;  %v3496_v22 = vld [vmem:[#allocation8 + $0xe8] ss:$16 sps:$4 sm:$0xff]  }
 0x598   :  { %v2596_v52 = vpop.eup %2595 }
 0x599   :  { %v2598_v17 = vpop.eup %2597  ;;  %v1577_v19 = vmul.f32 0.5, %v2596_v52  ;;  %v3481_v52 = vld [vmem:[#allocation8 + $0xc0] ss:$16 sps:$4 sm:$0xff]  }
 0x59a   :  { %v1585_v21 = vmul.f32 0.5, %v2598_v17  ;;  %v2600_v23 = vpop.eup %2599  ;;  %v3484_v17 = vld [vmem:[#allocation8 + $0xc8] ss:$16 sps:$4 sm:$0xff]  }
 0x59b   :  { %v1579_v16 = vadd.f32 0.5, %v1577_v19  ;;  %v2602_v8 = vpop.eup %2601  ;;  %v1578_v36 = vmul.f32 0.5, %v2600_v23  ;;  %v3487_v19 = vld [vmem:[#allocation8 + $0xe4] ss:$16 sps:$4 sm:$0xff]  }
 0x59c   :  { %v1587_v27 = vadd.f32 0.5, %v1585_v21  ;;  %v2604_v38 = vpop.eup %2603  ;;  %v3493_v21 = vld [vmem:[#allocation8 + $0xe0] ss:$16 sps:$4 sm:$0xff]  }
 0x59d   :  { %v1601_v39 = vmul.f32 %v2602_v8, %v1579_v16  ;;  %v1580_v10 = vadd.f32 0.5, %v1578_v36  ;;  %v1586_v41 = vmul.f32 0.5, %v2604_v38  ;;  %v2606_v42 = vpop.eup %2605 }
 0x59e   :  { %v1599_v40 = vmul.f32 %v1587_v27, %v3346_v25  ;;  %v2608_v53 = vpop.eup %2607 }
 0x59f   :  { %v1588_v45 = vadd.f32 0.5, %v1586_v41  ;;  %v1602_v46 = vmul.f32 %v2606_v42, %v1580_v10  ;;  %v2610_v54 = vpop.eup %2609  ;;  %v1595_v55 = vmul.f32 0.5, %v2608_v53 }
 0x5a0   :  { %v3426_v44 = vadd.f32 %v1601_v39, %v1599_v40  ;;  %v1596_v25 = vmul.f32 0.5, %v2610_v54 }
 0x5a1   :  { %v1600_v47 = vmul.f32 %v1588_v45, %v3350_v37  ;;  %v1597_v57 = vadd.f32 0.5, %v1595_v55  ;;  %v3447_v37 = vld [vmem:[#allocation8 + $0x60] ss:$16 sps:$4 sm:$0xff]  }
 0x5a2   :  { %2611 = vtanh.f32 %v3426_v44  ;;  %v1598_v58 = vadd.f32 0.5, %v1596_v25 }
 0x5a3   :  { %v3430_v48 = vadd.f32 %v1602_v46, %v1600_v47 }
 0x5a5   :  { %2613 = vtanh.f32 %v3430_v48 }
 0x5ac   :  { %v2612_v56 = vpop.eup %2611 }
 0x5ad   :  { %v1607_v60 = vmul.f32 %v2612_v56, %v1597_v57 }
 0x5af   :  { %v2614_v59 = vpop.eup %2613 }
 0x5b0   :  { %v1608_v62 = vmul.f32 %v2614_v59, %v1598_v58 }
 0x5b2   :  { %v1609_v63 = vpack.c.bf16 %v1608_v62, %v1607_v60 }
 0x5b4   :  { %2252 = vst [vmem:[#allocation12 + $0x20] sm:$0xff] %v1609_v63   ;;  %1662 = vmatmul.mubr.bf16.vlgmr.msra.gmra.mrb[20].mxu0 %v1609_v63  ;;  %1705 = vmatmul.mubr.bf16.vlgmr.msra.gmra.mrb[20].mxu1 %v1609_v63 }
 0x5b5   :  { %1780 = vmatpush1.bf16.msra.mxu0 %v3353_v15  ;;  %1823 = vmatpush1.bf16.msra.mxu1 %v3356_v50 }
 0x5b6   :  { %1781 = vmatprep.subr.bf16.mxu0 %v3359_v33  ;;  %1824 = vmatprep.subr.bf16.mxu1 %v3362_v34 }
 0x5b7   :  { %1811 = vmatprep.mubr.bf16.mxu0 %v2904_v0  ;;  %1854 = vmatprep.mubr.bf16.mxu1 %v2904_v0 }
 0x5b9   :  { %1782 = vmatpush1.bf16.msra.mxu0 %v3367_v12  ;;  %1825 = vmatpush1.bf16.msra.mxu1 %v3370_v28 }
 0x5ba   :  { %1783 = vmatprep.subr.bf16.mxu0 %v3373_v26  ;;  %1826 = vmatprep.subr.bf16.mxu1 %v3376_v32 }
 0x5bd   :  { %1784 = vmatpush1.bf16.msra.mxu0 %v3379_v31  ;;  %1827 = vmatpush1.bf16.msra.mxu1 %v3382_v29 }
 0x5be   :  { %1785 = vmatprep.subr.bf16.mxu0 %v3385_v35  ;;  %1828 = vmatprep.subr.bf16.mxu1 %v3388_v43 }
 0x5c1   :  { %1786 = vmatpush1.bf16.msra.mxu0 %v3447_v37  ;;  %1829 = vmatpush1.bf16.msra.mxu1 %v3450_v1 }
 0x5c2   :  { %1787 = vmatprep.subr.bf16.mxu0 %v3393_v30  ;;  %1830 = vmatprep.subr.bf16.mxu1 %v3454_v2 }
 0x5c5   :  { %1788 = vmatpush1.bf16.msra.mxu0 %v3457_v3  ;;  %1831 = vmatpush1.bf16.msra.mxu1 %v3460_v4 }
 0x5c6   :  { %1789 = vmatprep.subr.bf16.mxu0 %v3463_v5  ;;  %1832 = vmatprep.subr.bf16.mxu1 %v3466_v61 }
 0x5c9   :  { %1790 = vmatpush1.bf16.msra.mxu0 %v3469_v7  ;;  %1833 = vmatpush1.bf16.msra.mxu1 %v3472_v11 }
 0x5ca   :  { %1791 = vmatprep.subr.bf16.mxu0 %v3475_v13  ;;  %1834 = vmatprep.subr.bf16.mxu1 %v3478_v14 }
 0x5cd   :  { %1792 = vmatpush1.bf16.msra.mxu0 %v3481_v52  ;;  %1835 = vmatpush1.bf16.msra.mxu1 %v3484_v17 }
 0x5ce   :  { %1793 = vmatprep.subr.bf16.mxu0 %v3487_v19  ;;  %1836 = vmatprep.subr.bf16.mxu1 %v3490_v6 }
 0x5d1   :  { %1794 = vmatpush1.bf16.msra.mxu0 %v3493_v21  ;;  %1837 = vmatpush1.bf16.msra.mxu1 %v3496_v22 }
 0x5d2   :  { %1929 = vmatprep.subr.bf16.mxu0 %v3411_v49  ;;  %1972 = vmatprep.subr.bf16.mxu1 %v3414_v51 }
 0x687   :  { %v1663_v23 = vpop.f32.mrb[20].mxu0  ;;  %v1706_v16 = vpop.f32.mrb[20].mxu1 }
 0x688   :  { %v2288_v8 = vadd.f32 %v1663_v23, %v3175_v18  ;;  %v1665_v27 = vpop.f32.mrb[21].mxu0  ;;  %v1708_v36 = vpop.f32.mrb[21].mxu1  ;;  %v2320_v51 = vadd.f32 %v1706_v16, %v3180_v24 }
 0x689   :  { %v2289_v38 = vadd.f32 %v1665_v27, %v3177_v20  ;;  %v1667_v39 = vpop.f32.mrb[22].mxu0  ;;  %v1710_v40 = vpop.f32.mrb[22].mxu1  ;;  %v2321_v55 = vadd.f32 %v1708_v36, %v3186_v9 }
 0x68a   :  { %v1723_v10 = vmul.f32 0.5, %v2288_v8  ;;  %v2290_v41 = vadd.f32 %v1667_v39, %v3175_v18  ;;  %v1669_v42 = vpop.f32.mrb[23].mxu0  ;;  %v1712_v45 = vpop.f32.mrb[23].mxu1  ;;  %v2322_v54 = vadd.f32 %v1710_v40, %v3180_v24 }
 0x68b   :  { %v1731_v46 = vmul.f32 0.5, %v2289_v38  ;;  %v2291_v49 = vadd.f32 %v1669_v42, %v3177_v20  ;;  %v2323_v25 = vadd.f32 %v1712_v45, %v3186_v9  ;;  %v1741_v59 = vmul.f32 0.5, %v2321_v55 }
 0x68c   :  { %2615 = vtanh.f32 %v1723_v10  ;;  %v1724_v47 = vmul.f32 0.5, %v2290_v41 }
 0x68d   :  { %2617 = vtanh.f32 %v1731_v46  ;;  %v1732_v53 = vmul.f32 0.5, %v2291_v49  ;;  %v1742_v62 = vmul.f32 0.5, %v2323_v25 }
 0x68e   :  { %2619 = vtanh.f32 %v1724_v47 }
 0x68f   :  { %2621 = vtanh.f32 %v2320_v51 }
 0x690   :  { %2623 = vtanh.f32 %v1732_v53 }
 0x691   :  { %2625 = vtanh.f32 %v2322_v54 }
 0x692   :  { %2627 = vtanh.f32 %v1741_v59 }
 0x693   :  { %2629 = vtanh.f32 %v1742_v62 }
 0x696   :  { %v2616_v56 = vpop.eup %2615 }
 0x697   :  { %v2618_v57 = vpop.eup %2617  ;;  %v1727_v58 = vmul.f32 0.5, %v2616_v56 }
 0x698   :  { %v1735_v60 = vmul.f32 0.5, %v2618_v57  ;;  %v2620_v63 = vpop.eup %2619 }
 0x699   :  { %v1729_v23 = vadd.f32 0.5, %v1727_v58  ;;  %v2622_v16 = vpop.eup %2621  ;;  %v1728_v27 = vmul.f32 0.5, %v2620_v63 }
 0x69a   :  { %v1737_v8 = vadd.f32 0.5, %v1735_v60  ;;  %v2624_v38 = vpop.eup %2623 }
 0x69b   :  { %v1751_v39 = vmul.f32 %v2622_v16, %v1729_v23  ;;  %v1730_v36 = vadd.f32 0.5, %v1728_v27  ;;  %v1736_v10 = vmul.f32 0.5, %v2624_v38  ;;  %v2626_v41 = vpop.eup %2625 }
 0x69c   :  { %v1749_v40 = vmul.f32 %v1737_v8, %v3426_v44  ;;  %v2628_v47 = vpop.eup %2627 }
 0x69d   :  { %v1738_v45 = vadd.f32 0.5, %v1736_v10  ;;  %v1752_v46 = vmul.f32 %v2626_v41, %v1730_v36  ;;  %v2630_v53 = vpop.eup %2629  ;;  %v1745_v54 = vmul.f32 0.5, %v2628_v47 }
 0x69e   :  { %v3510_v42 = vadd.f32 %v1751_v39, %v1749_v40  ;;  %v1746_v44 = vmul.f32 0.5, %v2630_v53 }
 0x69f   :  { %v1750_v49 = vmul.f32 %v1738_v45, %v3430_v48  ;;  %v1747_v25 = vadd.f32 0.5, %v1745_v54 }
 0x6a0   :  { %2631 = vtanh.f32 %v3510_v42  ;;  %v1748_v56 = vadd.f32 0.5, %v1746_v44 }
 0x6a1   :  { %v3514_v51 = vadd.f32 %v1752_v46, %v1750_v49 }
 0x6a3   :  { %2633 = vtanh.f32 %v3514_v51 }
 0x6aa   :  { %v2632_v55 = vpop.eup %2631 }
 0x6ab   :  { %v1757_v58 = vmul.f32 %v2632_v55, %v1747_v25 }
 0x6ad   :  { %v2634_v57 = vpop.eup %2633 }
 0x6ae   :  { %v1758_v59 = vmul.f32 %v2634_v57, %v1748_v56 }
 0x6b0   :  { %v1759_v60 = vpack.c.bf16 %v1758_v59, %v1757_v58 }
 0x6b2   :  { %2257 = vst [vmem:[#allocation12 + $0x28] sm:$0xff] %v1759_v60   ;;  %1812 = vmatmul.mubr.bf16.vlgmr.msra.gmra.mrb[24].mxu0 %v1759_v60  ;;  %1855 = vmatmul.mubr.bf16.vlgmr.msra.gmra.mrb[24].mxu1 %v1759_v60 }
 0x6b3   :  { %1930 = vmatpush1.bf16.msra.mxu0 %v3353_v15  ;;  %1973 = vmatpush1.bf16.msra.mxu1 %v3356_v50 }
 0x6b4   :  { %1931 = vmatprep.subr.bf16.mxu0 %v3359_v33  ;;  %1974 = vmatprep.subr.bf16.mxu1 %v3362_v34 }
 0x6b5   :  { %1961 = vmatprep.mubr.bf16.mxu0 %v2904_v0  ;;  %2004 = vmatprep.mubr.bf16.mxu1 %v2904_v0 }
 0x6b7   :  { %1932 = vmatpush1.bf16.msra.mxu0 %v3367_v12  ;;  %1975 = vmatpush1.bf16.msra.mxu1 %v3370_v28 }
 0x6b8   :  { %1933 = vmatprep.subr.bf16.mxu0 %v3373_v26  ;;  %1976 = vmatprep.subr.bf16.mxu1 %v3376_v32 }
 0x6bb   :  { %1934 = vmatpush1.bf16.msra.mxu0 %v3379_v31  ;;  %1977 = vmatpush1.bf16.msra.mxu1 %v3382_v29 }
 0x6bc   :  { %1935 = vmatprep.subr.bf16.mxu0 %v3385_v35  ;;  %1978 = vmatprep.subr.bf16.mxu1 %v3388_v43 }
 0x6bf   :  { %1936 = vmatpush1.bf16.msra.mxu0 %v3447_v37  ;;  %1979 = vmatpush1.bf16.msra.mxu1 %v3450_v1 }
 0x6c0   :  { %1937 = vmatprep.subr.bf16.mxu0 %v3393_v30  ;;  %1980 = vmatprep.subr.bf16.mxu1 %v3454_v2 }
 0x6c3   :  { %1938 = vmatpush1.bf16.msra.mxu0 %v3457_v3  ;;  %1981 = vmatpush1.bf16.msra.mxu1 %v3460_v4 }
 0x6c4   :  { %1939 = vmatprep.subr.bf16.mxu0 %v3463_v5  ;;  %1982 = vmatprep.subr.bf16.mxu1 %v3466_v61 }
 0x6c7   :  { %1940 = vmatpush1.bf16.msra.mxu0 %v3469_v7  ;;  %1983 = vmatpush1.bf16.msra.mxu1 %v3472_v11 }
 0x6c8   :  { %1941 = vmatprep.subr.bf16.mxu0 %v3475_v13  ;;  %1984 = vmatprep.subr.bf16.mxu1 %v3478_v14 }
 0x6cb   :  { %1942 = vmatpush1.bf16.msra.mxu0 %v3481_v52  ;;  %1985 = vmatpush1.bf16.msra.mxu1 %v3484_v17 }
 0x6cc   :  { %1943 = vmatprep.subr.bf16.mxu0 %v3487_v19  ;;  %1986 = vmatprep.subr.bf16.mxu1 %v3490_v6 }
 0x6cf   :  { %1944 = vmatpush1.bf16.msra.mxu0 %v3493_v21  ;;  %1987 = vmatpush1.bf16.msra.mxu1 %v3496_v22 }
 0x785   :  { %v1813_v0 = vpop.f32.mrb[24].mxu0  ;;  %v1856_v15 = vpop.f32.mrb[24].mxu1 }
 0x786   :  { %v2292_v50 = vadd.f32 %v1813_v0, %v3175_v18  ;;  %v1815_v33 = vpop.f32.mrb[25].mxu0  ;;  %v1858_v34 = vpop.f32.mrb[25].mxu1  ;;  %v2324_v48 = vadd.f32 %v1856_v15, %v3180_v24 }
 0x787   :  { %v2293_v12 = vadd.f32 %v1815_v33, %v3177_v20  ;;  %v1817_v28 = vpop.f32.mrb[26].mxu0  ;;  %v1860_v26 = vpop.f32.mrb[26].mxu1  ;;  %v2325_v3 = vadd.f32 %v1858_v34, %v3186_v9 }
 0x788   :  { %v1873_v32 = vmul.f32 0.5, %v2292_v50  ;;  %v2294_v31 = vadd.f32 %v1817_v28, %v3175_v18  ;;  %v1819_v29 = vpop.f32.mrb[27].mxu0  ;;  %v1862_v35 = vpop.f32.mrb[27].mxu1  ;;  %v2326_v2 = vadd.f32 %v1860_v26, %v3180_v24 }
 0x789   :  { %v1881_v43 = vmul.f32 0.5, %v2293_v12  ;;  %v2295_v30 = vadd.f32 %v1819_v29, %v3177_v20  ;;  %v2327_v4 = vadd.f32 %v1862_v35, %v3186_v9  ;;  %v1891_v11 = vmul.f32 0.5, %v2325_v3 }
 0x78a   :  { %2635 = vtanh.f32 %v1873_v32  ;;  %v1874_v37 = vmul.f32 0.5, %v2294_v31 }
 0x78b   :  { %2637 = vtanh.f32 %v1881_v43  ;;  %v1882_v1 = vmul.f32 0.5, %v2295_v30  ;;  %v1892_v14 = vmul.f32 0.5, %v2327_v4 }
 0x78c   :  { %2639 = vtanh.f32 %v1874_v37 }
 0x78d   :  { %2641 = vtanh.f32 %v2324_v48 }
 0x78e   :  { %2643 = vtanh.f32 %v1882_v1 }
 0x78f   :  { %2645 = vtanh.f32 %v2326_v2 }
 0x790   :  { %2647 = vtanh.f32 %v1891_v11 }
 0x791   :  { %2649 = vtanh.f32 %v1892_v14 }
 0x794   :  { %v2636_v5 = vpop.eup %2635 }
 0x795   :  { %v2638_v61 = vpop.eup %2637  ;;  %v1877_v7 = vmul.f32 0.5, %v2636_v5 }
 0x796   :  { %v1885_v13 = vmul.f32 0.5, %v2638_v61  ;;  %v2640_v52 = vpop.eup %2639 }
 0x797   :  { %v1879_v17 = vadd.f32 0.5, %v1877_v7  ;;  %v2642_v19 = vpop.eup %2641  ;;  %v1878_v21 = vmul.f32 0.5, %v2640_v52 }
 0x798   :  { %v1887_v6 = vadd.f32 0.5, %v1885_v13  ;;  %v2644_v22 = vpop.eup %2643 }
 0x799   :  { %v1901_v62 = vmul.f32 %v2642_v19, %v1879_v17  ;;  %v1880_v23 = vadd.f32 0.5, %v1878_v21  ;;  %v1886_v16 = vmul.f32 0.5, %v2644_v22  ;;  %v2646_v8 = vpop.eup %2645 }
 0x79a   :  { %v1899_v63 = vmul.f32 %v1887_v6, %v3510_v42  ;;  %v2648_v10 = vpop.eup %2647 }
 0x79b   :  { %v1888_v38 = vadd.f32 0.5, %v1886_v16  ;;  %v1902_v39 = vmul.f32 %v2646_v8, %v1880_v23  ;;  %v2650_v41 = vpop.eup %2649  ;;  %v1895_v45 = vmul.f32 0.5, %v2648_v10 }
 0x79c   :  { %v1903_v27 = vadd.f32 %v1901_v62, %v1899_v63  ;;  %v1896_v46 = vmul.f32 0.5, %v2650_v41 }
 0x79d   :  { %v1900_v40 = vmul.f32 %v1888_v38, %v3514_v51  ;;  %v1897_v42 = vadd.f32 0.5, %v1895_v45 }
 0x79e   :  { %2651 = vtanh.f32 %v1903_v27  ;;  %v1898_v47 = vadd.f32 0.5, %v1896_v46 }
 0x79f   :  { %v3559_v36 = vadd.f32 %v1902_v39, %v1900_v40 }
 0x7a1   :  { %2653 = vtanh.f32 %v3559_v36 }
 0x7a8   :  { %v2652_v49 = vpop.eup %2651 }
 0x7a9   :  { %v1907_v54 = vmul.f32 %v2652_v49, %v1897_v42 }
 0x7ab   :  { %v2654_v53 = vpop.eup %2653 }
 0x7ac   :  { %v1908_v44 = vmul.f32 %v2654_v53, %v1898_v47 }
 0x7ae   :  { %v1909_v55 = vpack.c.bf16 %v1908_v44, %v1907_v54 }
 0x7b0   :  { %2262 = vst [vmem:[#allocation12 + $0x30] sm:$0xff] %v1909_v55   ;;  %1962 = vmatmul.mubr.bf16.vlgmr.msra.gmra.mrb[28].mxu0 %v1909_v55  ;;  %2005 = vmatmul.mubr.bf16.vlgmr.msra.gmra.mrb[28].mxu1 %v1909_v55 }
 0x883   :  { %v1963_v51 = vpop.f32.mrb[28].mxu0  ;;  %v2006_v25 = vpop.f32.mrb[28].mxu1 }
 0x884   :  { %v2296_v56 = vadd.f32 %v1963_v51, %v3175_v18  ;;  %v1965_v57 = vpop.f32.mrb[29].mxu0  ;;  %v2008_v58 = vpop.f32.mrb[29].mxu1  ;;  %v2328_v26 = vadd.f32 %v2006_v25, %v3180_v24 }
 0x885   :  { %v2297_v59 = vadd.f32 %v1965_v57, %v3177_v20  ;;  %v1967_v60 = vpop.f32.mrb[30].mxu0  ;;  %v2010_v0 = vpop.f32.mrb[30].mxu1  ;;  %v2329_v35 = vadd.f32 %v2008_v58, %v3186_v9 }
 0x886   :  { %v2023_v15 = vmul.f32 0.5, %v2296_v56  ;;  %v2298_v50 = vadd.f32 %v1967_v60, %v3175_v18  ;;  %v1969_v33 = vpop.f32.mrb[31].mxu0  ;;  %v2012_v34 = vpop.f32.mrb[31].mxu1  ;;  %v2330_v29 = vadd.f32 %v2010_v0, %v3180_v24 }
 0x887   :  { %v2031_v12 = vmul.f32 0.5, %v2297_v59  ;;  %v2299_v28 = vadd.f32 %v1969_v33, %v3177_v20  ;;  %v2041_v18 = vmul.f32 0.5, %v2329_v35  ;;  %v2331_v43 = vadd.f32 %v2012_v34, %v3186_v9 }
 0x888   :  { %2655 = vtanh.f32 %v2023_v15  ;;  %v2024_v32 = vmul.f32 0.5, %v2298_v50 }
 0x889   :  { %2657 = vtanh.f32 %v2031_v12  ;;  %v2032_v31 = vmul.f32 0.5, %v2299_v28  ;;  %v2042_v1 = vmul.f32 0.5, %v2331_v43 }
 0x88a   :  { %2659 = vtanh.f32 %v2024_v32 }
 0x88b   :  { %2661 = vtanh.f32 %v2328_v26 }
 0x88c   :  { %2663 = vtanh.f32 %v2032_v31 }
 0x88d   :  { %2665 = vtanh.f32 %v2330_v29 }
 0x88e   :  { %2667 = vtanh.f32 %v2041_v18 }
 0x88f   :  { %2669 = vtanh.f32 %v2042_v1 }
 0x892   :  { %v2656_v30 = vpop.eup %2655 }
 0x893   :  { %v2658_v48 = vpop.eup %2657  ;;  %v2027_v20 = vmul.f32 0.5, %v2656_v30 }
 0x894   :  { %v2035_v37 = vmul.f32 0.5, %v2658_v48  ;;  %v2660_v2 = vpop.eup %2659 }
 0x895   :  { %v2029_v3 = vadd.f32 0.5, %v2027_v20  ;;  %v2662_v4 = vpop.eup %2661  ;;  %v2028_v61 = vmul.f32 0.5, %v2660_v2 }
 0x896   :  { %v2037_v5 = vadd.f32 0.5, %v2035_v37  ;;  %v2664_v24 = vpop.eup %2663 }
 0x897   :  { %v2051_v7 = vmul.f32 %v2662_v4, %v2029_v3  ;;  %v2030_v13 = vadd.f32 0.5, %v2028_v61  ;;  %v2036_v14 = vmul.f32 0.5, %v2664_v24  ;;  %v2666_v52 = vpop.eup %2665 }
 0x898   :  { %v2049_v11 = vmul.f32 %v2037_v5, %v1903_v27  ;;  %v2668_v21 = vpop.eup %2667 }
 0x899   :  { %v2038_v9 = vadd.f32 0.5, %v2036_v14  ;;  %v2052_v19 = vmul.f32 %v2666_v52, %v2030_v13  ;;  %v2045_v62 = vmul.f32 0.5, %v2668_v21  ;;  %v2670_v63 = vpop.eup %2669 }
 0x89a   :  { %v2053_v17 = vadd.f32 %v2051_v7, %v2049_v11  ;;  %v2046_v16 = vmul.f32 0.5, %v2670_v63 }
 0x89b   :  { %v2050_v6 = vmul.f32 %v2038_v9, %v3559_v36  ;;  %v2047_v23 = vadd.f32 0.5, %v2045_v62 }
 0x89c   :  { %2671 = vtanh.f32 %v2053_v17  ;;  %2072 = vst [vmem:[#allocation15] sm:$0xff] %v2053_v17  ;;  %v2048_v38 = vadd.f32 0.5, %v2046_v16 }
 0x89d   :  { %v2054_v22 = vadd.f32 %v2052_v19, %v2050_v6 }
 0x89f   :  { %2673 = vtanh.f32 %v2054_v22  ;;  %2073 = vst [vmem:[#allocation15 + $0x8] sm:$0xff] %v2054_v22 }
 0x8a6   :  { %v2672_v8 = vpop.eup %2671 }
 0x8a7   :  { %v2057_v27 = vmul.f32 %v2672_v8, %v2047_v23 }
 0x8a9   :  { %2070 = vst [vmem:[#allocation13] sm:$0xff] %v2057_v27  ;;  %v2674_v39 = vpop.eup %2673 }
 0x8aa   :  { %v2058_v40 = vmul.f32 %v2674_v39, %v2048_v38 }
 0x8ac   :  { %v2266_v36 = vpack.c.bf16 %v2058_v40, %v2057_v27  ;;  %2071 = vst [vmem:[#allocation13 + $0x8] sm:$0xff] %v2058_v40 }
 0x8ad   :  { %2828 = shalt.err (!%p2825_p2)
}
 0x8ae   :  { %s2829_s12 = scalar_lea.hbm %s3637_s7, 256 }
 0x8af   :  { %p2830_p3 = scmp.ne.s32.totalorder %s3637_s7, %s2829_s12  ;;  %p2833_p4 = scmp.lt.u32.totalorder %s2829_s12, %s3637_s7 }
 0x8b1   :  { %p2835_p5 = pnand %p2833_p4, %p2830_p3 }
 0x8b3   :  { %2838 = shalt.err (!%p2835_p5)
}
 0x8b4   :  { %2097 = dma.vmem_to_hbm [thread:$0]  %s2092_s30, 256, %s3637_s7, [#allocation14], %s2902_s2, %s2902_s2, %s2903_s15   ;;  %2267 = vst [vmem:[#allocation12 + $0x38] sm:$0xff] %v2266_v36  }
 0x8b5   :  { %s2839_s23 = scalar_lea.vmem %s3571_s28, 256  ;;  %p2844_p7 = scmp.lt.s32.totalorder %s3571_s28, %s3571_s28 }
 0x8b6   :  { %p2840_p6 = scmp.ne.s32.totalorder %s3571_s28, %s2839_s23  ;;  %p2845_p8 = scmp.lt.s32.totalorder %s2839_s23, %s2839_s23 }
 0x8b8   :  { %p2846_p9 = por %p2845_p8, %p2844_p7 }
 0x8ba   :  { %p2847_p10 = pnand %p2846_p9, %p2840_p6 }
 0x8bc   :  { %2850 = shalt.err (!%p2847_p10)
}
 0x8bd   :  { %s2851_s25 = scalar_lea.hbm %s3638_s8, 256 }
 0x8be   :  { %p2852_p11 = scmp.ne.s32.totalorder %s3638_s8, %s2851_s25  ;;  %p2855_p12 = scmp.lt.u32.totalorder %s2851_s25, %s3638_s8 }
 0x8c0   :  { %p2857_p13 = pnand %p2855_p12, %p2852_p11 }
 0x8c2   :  { %2860 = shalt.err (!%p2857_p13)
}
 0x8c3   :  { %2109 = dma.vmem_to_hbm [thread:$0]  %s3571_s28, 256, %s3638_s8, [#allocation14], %s2902_s2, %s2902_s2, %s2903_s15  }
 0x8c4   :  { %s2861_s30 = scalar_lea.vmem %s3573_s10, 1024  ;;  %p2866_p1 = scmp.lt.s32.totalorder %s3573_s10, %s3573_s10 }
 0x8c5   :  { %p2862_p0 = scmp.ne.s32.totalorder %s3573_s10, %s2861_s30  ;;  %p2867_p2 = scmp.lt.s32.totalorder %s2861_s30, %s2861_s30 }
 0x8c7   :  { %p2868_p3 = por %p2867_p2, %p2866_p1 }
 0x8c9   :  { %p2869_p4 = pnand %p2868_p3, %p2862_p0 }
 0x8cb   :  { %2872 = shalt.err (!%p2869_p4)
}
 0x8cc   :  { %s2873_s11 = scalar_lea.hbm %s3636_s6, 1024 }
 0x8cd   :  { %p2874_p5 = scmp.ne.s32.totalorder %s3636_s6, %s2873_s11  ;;  %p2877_p6 = scmp.lt.u32.totalorder %s2873_s11, %s3636_s6 }
 0x8cf   :  { %p2879_p7 = pnand %p2877_p6, %p2874_p5 }
 0x8d1   :  { %2882 = shalt.err (!%p2879_p7)
}
 0x8d2   :  { %2085 = dma.vmem_to_hbm [thread:$0]  %s3573_s10, 1024, %s3636_s6, [#allocation5], %s2898_s3, %s2898_s3, %s2899_s20  }
 0x8d3   :  { %2889 = dma.done.wait [#allocation5], 1024  }
 0x8d4   :  { %2890 = vsyncadd [#allocation5], 4294966272 }
 0x8d5   :  { %2891 = dma.done.wait [#allocation14], 512  }
 0x8d6   :  { %2892 = vsyncadd [#allocation14], 4294966784 }
 0x8d7   :  { %2119 = vsyncpa [#allocation4], 1 }
 0x8d8   :  { %2120 = vsyncpa [#allocation7], 1 }
 0x8d9   :  { %2121 = vsyncpa [#allocation10], 1 }
 0x8da   :  { %2122 = vsyncpa [#allocation5], 1 }
 0x8db   :  { %2123 = vsyncpa [#allocation14], 1 }

</bundles_post_ra>
